<compile_context>
chip_gen: v5e
topology: v5e:2x2
jax: 0.10.0
libtpu: 0.0.40
codegen_flags: <defaults>
</compile_context>

<pallas_src>
import functools

import jax
import jax.numpy as jnp
import numpy as np
from jax.experimental import pallas as pl
from jax.experimental.pallas import tpu as pltpu


def _round_up(x, m):
    return (x + m - 1) // m * m


# ----------------------------- Pallas kernel --------------------------------
def gru_chunk_kernel(x_ref, wih_ref, whh_ref, bpre_ref, bhn_ref,
                     out_ref, h_s, gi_s, *, Tc, Bt, Hp):
    """One grid step == one (batch-tile, time-chunk) of the GRU.

    Grid = (nb, nc): axis 0 = batch tiles ("parallel"), axis 1 = time chunks
    ("arbitrary", sequential; h_s is the carried hidden state).

    x_ref   : (Tc*Bt, E)     embedded inputs for this chunk (time-major rows)
    wih_ref : (E, 3*Hp)      W_ih^T, gate-aligned (each gate at a 128-lane offset)
    whh_ref : (Hp, 3*Hp)     W_hh^T, gate-aligned
    bpre_ref: (1, 3*Hp)      b_ih (+ b_hh for r,z gates), folded into the precompute
    bhn_ref : (1, Hp)        b_hh for the n gate (must stay inside r*(.))
    out_ref : (Tc*Bt, Hp)    outputs for this chunk (lane-dense)
    h_s     : (Bt, Hp) VMEM  carried hidden state for this batch tile
    gi_s    : (Tc*Bt, 3*Hp)  VMEM scratch for the batched input projection
    """
    c = pl.program_id(1)

    @pl.when(c == 0)
    def _():
        h_s[...] = jnp.zeros_like(h_s)

    # ---- Phase 1: batched input-to-hidden projection for the whole chunk ----
    #   (Tc*Bt, E) @ (E, 3*Hp) — one MXU-filling matmul, off the serial path.
    gi = jnp.dot(x_ref[...], wih_ref[...], preferred_element_type=jnp.float32)
    gi_s[...] = gi + bpre_ref[...]

    # ---- Hoisted loop invariants (loaded / broadcast ONCE per chunk) ----
    W = whh_ref[...]                                       # (Hp, 3*Hp)
    bhn_b = jnp.broadcast_to(bhn_ref[...], (Bt, Hp))       # (Bt, Hp)

    # ---- Phase 2: sequential recurrence, statically unrolled over the chunk ----
    # TODO(synk): hold W_hh resident in the MXU across the chunk via
    # pltpu.matmul_push_rhs / matmul_acc_lhs / matmul_pop to avoid re-pushing the
    # RHS weight tiles every step (largest remaining per-step cost, esp. on v5e).
    h = h_s[...]                                           # (Bt, Hp) f32
    for t in range(Tc):
        rows = pl.ds(t * Bt, Bt)                           # static, sublane-aligned
        g = gi_s[rows, :]                                  # (Bt, 3*Hp); gates 128-aligned
        gh = jnp.dot(h.astype(W.dtype), W,
                     preferred_element_type=jnp.float32)
        # PyTorch GRU gate order: r, z, n
        r = jax.nn.sigmoid(g[:, 0:Hp] + gh[:, 0:Hp])
        z = jax.nn.sigmoid(g[:, Hp:2 * Hp] + gh[:, Hp:2 * Hp])
        n = jnp.tanh(g[:, 2 * Hp:3 * Hp] + r * (gh[:, 2 * Hp:3 * Hp] + bhn_b))
        h = (1.0 - z) * n + z * h
        out_ref[rows, :] = h.astype(out_ref.dtype)         # full-lane (Hp-wide) store
    h_s[...] = h


# ---------------------- Param repacking (gate-aligned, padded) ---------------
def _gate_aligned_params(w_ih, w_hh, b_ih, b_hh, H, Hp, matmul_dtype):
    """Repack PyTorch-layout GRU params into padded, 128-lane gate-aligned layouts.

    Zero padding keeps the padded hidden lanes identically zero through the
    recurrence (r_pad = z_pad = 0.5, n_pad = 0 => h_pad stays 0).
    """
    E = w_ih.shape[1]
    wih_g = w_ih.reshape(3, H, E)                        # (gate, H, E)
    whh_g = w_hh.reshape(3, H, H)                        # (gate, H_out, H_in)
    bih_g = b_ih.reshape(3, H)
    bhh_g = b_hh.reshape(3, H)

    wih_p = jnp.zeros((E, 3, Hp), jnp.float32)
    wih_p = wih_p.at[:, :, :H].set(jnp.transpose(wih_g, (2, 0, 1)))
    wih_p = wih_p.reshape(E, 3 * Hp).astype(matmul_dtype)

    whh_p = jnp.zeros((Hp, 3, Hp), jnp.float32)
    whh_p = whh_p.at[:H, :, :H].set(jnp.transpose(whh_g, (2, 0, 1)))
    whh_p = whh_p.reshape(Hp, 3 * Hp).astype(matmul_dtype)

    b_pre = jnp.zeros((3, Hp), jnp.float32)
    b_pre = b_pre.at[0, :H].set(bih_g[0] + bhh_g[0])     # r: fold b_hh_r
    b_pre = b_pre.at[1, :H].set(bih_g[1] + bhh_g[1])     # z: fold b_hh_z
    b_pre = b_pre.at[2, :H].set(bih_g[2])                # n: b_ih only
    b_pre = b_pre.reshape(1, 3 * Hp)

    b_hn = jnp.zeros((1, Hp), jnp.float32).at[0, :H].set(bhh_g[2])
    return wih_p, whh_p, b_pre, b_hn


# ------------------------------- GRU wrapper ---------------------------------
def gru_pallas(x_emb, w_ih, w_hh, b_ih, b_hh, *, time_chunk=32, batch_tile=None,
               matmul_dtype=jnp.bfloat16):
    """x_emb: [T, B, E] float32. Returns (output [T,B,H], hidden [1,B,H])."""
    T, B, E = x_emb.shape
    H = w_hh.shape[1]
    Hp = _round_up(H, 128)                 # lane-dense / gate-aligned hidden width
    if batch_tile is None:
        batch_tile = min(_round_up(B, 8), 128)   # fill MXU height before splitting
    Bt = _round_up(batch_tile, 8)          # sublane-aligned batch tile
    Bp = _round_up(B, Bt)
    nb = Bp // Bt                          # batch tiles (parallel axis; megacore on v7x)
    Tc = min(time_chunk, max(T, 1))        # time steps per grid iteration
    nc = pl.cdiv(T, Tc)
    T_pad = nc * Tc

    wih_p, whh_p, b_pre, b_hn = _gate_aligned_params(
        w_ih, w_hh, b_ih, b_hh, H, Hp, matmul_dtype)

    # Layout plumbing: pad (T,B) -> (T_pad,Bp), split batch into tiles, flatten
    # (time, batch-in-tile) into a lane-dense row axis per tile.
    x_p = jnp.zeros((T_pad, Bp, E), matmul_dtype)
    x_p = x_p.at[:T, :B, :].set(x_emb.astype(matmul_dtype))
    x3 = (x_p.reshape(T_pad, nb, Bt, E).transpose(1, 0, 2, 3)
          .reshape(nb, T_pad * Bt, E))
    # TODO(synk): at larger E, pad E toward a 128-lane multiple (or keep x in bf16)
    # so the per-chunk x DMA is lane-dense; irrelevant at E=32.

    kernel = functools.partial(gru_chunk_kernel, Tc=Tc, Bt=Bt, Hp=Hp)

    # Explicit VMEM budget (matters for large H on v5e's 16 MiB scoped default and
    # v7x's 64 MiB physical VMEM). 2x margin + 4 MiB headroom, floor at the 32 MiB
    # default, cap at 64 MiB so it stays within v7x physical VMEM.
    itemsize = jnp.dtype(matmul_dtype).itemsize
    vmem_need = (2 * Tc * Bt * E * itemsize            # x chunk (double-buffered)
                 + 2 * Tc * Bt * Hp * 4                # out chunk (double-buffered)
                 + 2 * (E + Hp) * 3 * Hp * itemsize    # weights (default 2-deep)
                 + 4 * Hp * 4                          # biases
                 + Bt * Hp * 4 + Tc * Bt * 3 * Hp * 4)  # scratch (h_s, gi_s)
    vmem_limit = int(min(max(2 * vmem_need + (4 << 20), 32 << 20), 64 << 20))

    # TODO(synk): the four constant operands (W_ih^T, W_hh^T, biases) could use
    # pipeline_mode=pl.Buffered(1) to drop the second pipeline buffer at large H.
    grid_spec = pltpu.PrefetchScalarGridSpec(
        num_scalar_prefetch=0,
        grid=(nb, nc),
        in_specs=[
            pl.BlockSpec((None, Tc * Bt, E), lambda b, c: (b, c, 0)),   # x chunk
            pl.BlockSpec((E, 3 * Hp), lambda b, c: (0, 0)),             # W_ih^T (resident)
            pl.BlockSpec((Hp, 3 * Hp), lambda b, c: (0, 0)),            # W_hh^T (resident)
            pl.BlockSpec((1, 3 * Hp), lambda b, c: (0, 0)),             # folded bias
            pl.BlockSpec((1, Hp), lambda b, c: (0, 0)),                 # b_hh (n gate)
        ],
        out_specs=pl.BlockSpec((None, Tc * Bt, Hp), lambda b, c: (b, c, 0)),
        scratch_shapes=[
            pltpu.VMEM((Bt, Hp), jnp.float32),            # carried hidden state
            pltpu.VMEM((Tc * Bt, 3 * Hp), jnp.float32),   # per-chunk gi
        ],
    )
    out3 = pl.pallas_call(
        kernel,
        out_shape=jax.ShapeDtypeStruct((nb, T_pad * Bt, Hp), jnp.float32),
        grid_spec=grid_spec,
        compiler_params=pltpu.CompilerParams(
            dimension_semantics=("parallel", "arbitrary"),
            vmem_limit_bytes=vmem_limit),
    )(x3, wih_p, whh_p, b_pre, b_hn)

    out = (out3.reshape(nb, T_pad, Bt, Hp).transpose(1, 0, 2, 3)
           .reshape(T_pad, Bp, Hp)[:T, :B, :H])
    hidden = out[T - 1:T]            # final hidden == last output (1-layer GRU)
    return out, hidden


# ------------------------------ Module wrapper -------------------------------
def rnn_encoder_forward(x_tokens, emb_table, w_ih, w_hh, b_ih, b_hh,
                        *, time_chunk=32, batch_tile=None,
                        matmul_dtype=jnp.bfloat16):
    """Mirrors RnnEncoder.forward.

    x_tokens : [T, B] int32 token ids
    emb_table: [V, E]
    w_ih     : [3H, E]   (PyTorch layout, gate order r, z, n)
    w_hh     : [3H, H]
    b_ih, b_hh: [3H]
    Returns (output [T,B,H], hidden_state [1,B,H]).
    """
    # TODO(synk): fuse the embedding gather into the Pallas pipeline via scalar
    # prefetch (pl.Element index_map on emb_table) to avoid the [T,B,E] HBM
    # round trip; negligible at these toy sizes.
    x_emb = emb_table[x_tokens].astype(jnp.float32)            # [T, B, E]
    return gru_pallas(x_emb, w_ih, w_hh, b_ih, b_hh,
                      time_chunk=time_chunk, batch_tile=batch_tile,
                      matmul_dtype=matmul_dtype)


# ------------------------------ Pure-JAX reference ---------------------------
def rnn_encoder_reference(x_tokens, emb_table, w_ih, w_hh, b_ih, b_hh):
    x_emb = emb_table[x_tokens].astype(jnp.float32)
    T, B, E = x_emb.shape
    H = w_hh.shape[1]

    def step(h, x_t):
        gi = x_t @ w_ih.T + b_ih
        gh = h @ w_hh.T + b_hh
        r = jax.nn.sigmoid(gi[:, :H] + gh[:, :H])
        z = jax.nn.sigmoid(gi[:, H:2 * H] + gh[:, H:2 * H])
        n = jnp.tanh(gi[:, 2 * H:] + r * gh[:, 2 * H:])
        h_new = (1.0 - z) * n + z * h
        return h_new, h_new

    h0 = jnp.zeros((B, H), jnp.float32)
    h_last, outs = jax.lax.scan(step, h0, x_emb)
    return outs, h_last[None, :, :]


# ----------------------------------- Main ------------------------------------
if __name__ == "__main__":
    # Small shapes consistent with the module's forward.
    T, B = 20, 12               # max_len, batch_size
    V, E, H = 16, 32, 32        # vocab_size, embedding_dim, hidden_units

    key = jax.random.PRNGKey(0)
    k_emb, k_tok, k_wih, k_whh, k_bih, k_bhh = jax.random.split(key, 6)

    # Deterministic "pretrained" embedding and GRU params (PyTorch-style uniform init).
    emb_table = jax.random.normal(k_emb, (V, E), dtype=jnp.float32)
    bound = 1.0 / np.sqrt(H)
    w_ih = jax.random.uniform(k_wih, (3 * H, E), minval=-bound, maxval=bound, dtype=jnp.float32)
    w_hh = jax.random.uniform(k_whh, (3 * H, H), minval=-bound, maxval=bound, dtype=jnp.float32)
    b_ih = jax.random.uniform(k_bih, (3 * H,), minval=-bound, maxval=bound, dtype=jnp.float32)
    b_hh = jax.random.uniform(k_bhh, (3 * H,), minval=-bound, maxval=bound, dtype=jnp.float32)

    x_tokens = jax.random.randint(k_tok, (T, B), 0, V, dtype=jnp.int32)

    out_ref, hidden_ref = rnn_encoder_reference(x_tokens, emb_table, w_ih, w_hh, b_ih, b_hh)

    # (1) Exact-f32 MXU path (matches the PyTorch module's numerics).
    #     time_chunk=8 -> 3 time chunks (exercises the carried hidden state + time
    #     padding); batch_tile=8 -> 2 batch tiles (exercises the parallel batch axis
    #     used for v7x megacore).
    out, hidden = rnn_encoder_forward(x_tokens, emb_table, w_ih, w_hh, b_ih, b_hh,
                                      time_chunk=8, batch_tile=8,
                                      matmul_dtype=jnp.float32)
    out = jax.block_until_ready(out)
    hidden = jax.block_until_ready(hidden)
    assert out.shape == (T, B, H)
    assert hidden.shape == (1, B, H)
    np.testing.assert_allclose(np.asarray(out), np.asarray(out_ref), rtol=1e-5, atol=1e-5)
    np.testing.assert_allclose(np.asarray(hidden), np.asarray(hidden_ref), rtol=1e-5, atol=1e-5)

    # (2) Default fast path (bf16 MXU inputs, f32 accumulation + f32 gate math) —
    #     the recommended configuration on v6e/v7x; looser tolerance since bf16
    #     rounding compounds through the recurrence.
    out_bf, hidden_bf = rnn_encoder_forward(x_tokens, emb_table, w_ih, w_hh, b_ih, b_hh,
                                            time_chunk=8, batch_tile=8)
    out_bf = jax.block_until_ready(out_bf)
    hidden_bf = jax.block_until_ready(hidden_bf)
    np.testing.assert_allclose(np.asarray(out_bf), np.asarray(out_ref), rtol=5e-2, atol=5e-2)
    np.testing.assert_allclose(np.asarray(hidden_bf), np.asarray(hidden_ref), rtol=5e-2, atol=5e-2)

    print("KERNEL_OK")
</pallas_src>

<mosaic_0001>
module attributes {stable_mosaic.version = 11 : i64} {
  func.func @gru_chunk_kernel(%arg0: i32, %arg1: i32, %arg2: memref<1x64x32xf32, #tpu.memory_space<vmem>>, %arg3: memref<32x384xf32, #tpu.memory_space<vmem>>, %arg4: memref<128x384xf32, #tpu.memory_space<vmem>>, %arg5: memref<1x384xf32, #tpu.memory_space<vmem>>, %arg6: memref<1x128xf32, #tpu.memory_space<vmem>>, %arg7: memref<1x64x128xf32, #tpu.memory_space<vmem>>, %arg8: memref<8x128xf32, #tpu.memory_space<vmem>>, %arg9: memref<64x384xf32, #tpu.memory_space<vmem>>) attributes {dimension_semantics = [#tpu.dimension_semantics<parallel>, #tpu.dimension_semantics<arbitrary>], iteration_bounds = array<i64: 2, 3>, scalar_prefetch = 0 : i64, scratch_operands = 2 : i64, tpu.core_type = #tpu.core_type<tc>, window_params = [{transform_indices = @transform_0, window_bounds = array<i64: 1, 64, 32>}, {pipeline_mode = #tpu.pipeline_mode<synchronous>, transform_indices = @transform_1, window_bounds = array<i64: 32, 384>}, {pipeline_mode = #tpu.pipeline_mode<synchronous>, transform_indices = @transform_2, window_bounds = array<i64: 128, 384>}, {pipeline_mode = #tpu.pipeline_mode<synchronous>, transform_indices = @transform_3, window_bounds = array<i64: 1, 384>}, {pipeline_mode = #tpu.pipeline_mode<synchronous>, transform_indices = @transform_4, window_bounds = array<i64: 1, 128>}, {transform_indices = @transform_5, window_bounds = array<i64: 1, 64, 128>}]} {
    %c0_i32 = arith.constant 0 : i32
    %0 = arith.cmpi eq, %arg1, %c0_i32 : i32
    %1 = arith.extui %0 : i1 to i32
    %c0_i32_0 = arith.constant 0 : i32
    %2 = arith.cmpi ne, %1, %c0_i32_0 : i32
    scf.if %2 {
      %cst_82 = arith.constant 0.000000e+00 : f32
      %273 = vector.broadcast %cst_82 : f32 to vector<8x128xf32>
      %c0_83 = arith.constant 0 : index
      %c0_84 = arith.constant 0 : index
      %274 = vector.load %arg8[%c0_83, %c0_84] : memref<8x128xf32, #tpu.memory_space<vmem>>, vector<8x128xf32>
      tpu.vector_store %arg8[%c0_83, %c0_84], %273 {strides = array<i32>} : memref<8x128xf32, #tpu.memory_space<vmem>>, vector<8x128xf32>,
    } else {
    }
    %c0 = arith.constant 0 : index
    %c0_1 = arith.constant 0 : index
    %c0_2 = arith.constant 0 : index
    %3 = vector.load %arg2[%c0, %c0_1, %c0_2] : memref<1x64x32xf32, #tpu.memory_space<vmem>>, vector<1x64x32xf32>
    %4 = vector.shape_cast %3 : vector<1x64x32xf32> to vector<64x32xf32>
    %c0_3 = arith.constant 0 : index
    %c0_4 = arith.constant 0 : index
    %5 = vector.load %arg3[%c0_3, %c0_4] : memref<32x384xf32, #tpu.memory_space<vmem>>, vector<32x384xf32>
    %cst = arith.constant dense<0.000000e+00> : vector<64x384xf32>
    %6 = tpu.matmul %4, %5, %cst {dimension_numbers = #tpu.dot_dimension_numbers<[1], [0], [0], [1], [0, 0, 1, 1], [], []>} : vector<64x32xf32>, vector<32x384xf32>, vector<64x384xf32> -> vector<64x384xf32>
    %c0_5 = arith.constant 0 : index
    %c0_6 = arith.constant 0 : index
    %7 = vector.load %arg5[%c0_5, %c0_6] : memref<1x384xf32, #tpu.memory_space<vmem>>, vector<1x384xf32>
    %8 = vector.broadcast %7 : vector<1x384xf32> to vector<64x384xf32>
    %9 = arith.addf %6, %8 : vector<64x384xf32>
    %c0_7 = arith.constant 0 : index
    %c0_8 = arith.constant 0 : index
    %10 = vector.load %arg9[%c0_7, %c0_8] : memref<64x384xf32, #tpu.memory_space<vmem>>, vector<64x384xf32>
    tpu.vector_store %arg9[%c0_7, %c0_8], %9 {strides = array<i32>} : memref<64x384xf32, #tpu.memory_space<vmem>>, vector<64x384xf32>,
    %c0_9 = arith.constant 0 : index
    %c0_10 = arith.constant 0 : index
    %11 = vector.load %arg4[%c0_9, %c0_10] : memref<128x384xf32, #tpu.memory_space<vmem>>, vector<128x384xf32>
    %c0_11 = arith.constant 0 : index
    %c0_12 = arith.constant 0 : index
    %12 = vector.load %arg6[%c0_11, %c0_12] : memref<1x128xf32, #tpu.memory_space<vmem>>, vector<1x128xf32>
    %13 = vector.shape_cast %12 : vector<1x128xf32> to vector<1x128xf32>
    %14 = vector.broadcast %13 : vector<1x128xf32> to vector<8x128xf32>
    %c0_13 = arith.constant 0 : index
    %c0_14 = arith.constant 0 : index
    %15 = vector.load %arg8[%c0_13, %c0_14] : memref<8x128xf32, #tpu.memory_space<vmem>>, vector<8x128xf32>
    %c0_15 = arith.constant 0 : index
    %c0_16 = arith.constant 0 : index
    %16 = vector.load %arg9[%c0_15, %c0_16] : memref<64x384xf32, #tpu.memory_space<vmem>>, vector<8x384xf32>
    %cst_17 = arith.constant dense<0.000000e+00> : vector<8x384xf32>
    %17 = tpu.matmul %15, %11, %cst_17 {dimension_numbers = #tpu.dot_dimension_numbers<[1], [0], [0], [1], [0, 0, 1, 1], [], []>} : vector<8x128xf32>, vector<128x384xf32>, vector<8x384xf32> -> vector<8x384xf32>
    %18 = vector.extract_strided_slice %16 {offsets = [0, 0], sizes = [8, 128], strides = [1, 1]} : vector<8x384xf32> to vector<8x128xf32>
    %19 = vector.extract_strided_slice %17 {offsets = [0, 0], sizes = [8, 128], strides = [1, 1]} : vector<8x384xf32> to vector<8x128xf32>
    %20 = arith.addf %18, %19 : vector<8x128xf32>
    %21 = arith.negf %20 : vector<8x128xf32>
    %22 = math.exp %21 : vector<8x128xf32>
    %cst_18 = arith.constant 1.000000e+00 : f32
    %23 = vector.broadcast %cst_18 : f32 to vector<8x128xf32>
    %24 = arith.addf %23, %22 : vector<8x128xf32>
    %25 = arith.divf %23, %24 : vector<8x128xf32>
    %26 = vector.extract_strided_slice %16 {offsets = [0, 128], sizes = [8, 128], strides = [1, 1]} : vector<8x384xf32> to vector<8x128xf32>
    %27 = vector.extract_strided_slice %17 {offsets = [0, 128], sizes = [8, 128], strides = [1, 1]} : vector<8x384xf32> to vector<8x128xf32>
    %28 = arith.addf %26, %27 : vector<8x128xf32>
    %29 = arith.negf %28 : vector<8x128xf32>
    %30 = math.exp %29 : vector<8x128xf32>
    %cst_19 = arith.constant 1.000000e+00 : f32
    %31 = vector.broadcast %cst_19 : f32 to vector<8x128xf32>
    %32 = arith.addf %31, %30 : vector<8x128xf32>
    %33 = arith.divf %31, %32 : vector<8x128xf32>
    %34 = vector.extract_strided_slice %16 {offsets = [0, 256], sizes = [8, 128], strides = [1, 1]} : vector<8x384xf32> to vector<8x128xf32>
    %35 = vector.extract_strided_slice %17 {offsets = [0, 256], sizes = [8, 128], strides = [1, 1]} : vector<8x384xf32> to vector<8x128xf32>
    %36 = arith.addf %35, %14 : vector<8x128xf32>
    %37 = arith.mulf %25, %36 : vector<8x128xf32>
    %38 = arith.addf %34, %37 : vector<8x128xf32>
    %39 = math.tanh %38 : vector<8x128xf32>
    %cst_20 = arith.constant 1.000000e+00 : f32
    %40 = vector.broadcast %cst_20 : f32 to vector<8x128xf32>
    %41 = arith.subf %40, %33 : vector<8x128xf32>
    %42 = arith.mulf %41, %39 : vector<8x128xf32>
    %43 = arith.mulf %33, %15 : vector<8x128xf32>
    %44 = arith.addf %42, %43 : vector<8x128xf32>
    %c0_21 = arith.constant 0 : index
    %c0_22 = arith.constant 0 : index
    %c0_23 = arith.constant 0 : index
    %45 = vector.load %arg7[%c0_21, %c0_22, %c0_23] : memref<1x64x128xf32, #tpu.memory_space<vmem>>, vector<1x8x128xf32>
    %46 = vector.shape_cast %45 : vector<1x8x128xf32> to vector<8x128xf32>
    %47 = vector.shape_cast %44 : vector<8x128xf32> to vector<1x8x128xf32>
    tpu.vector_store %arg7[%c0_21, %c0_22, %c0_23], %47 {strides = array<i32>} : memref<1x64x128xf32, #tpu.memory_space<vmem>>, vector<1x8x128xf32>,
    %c8 = arith.constant 8 : index
    %c0_24 = arith.constant 0 : index
    %48 = vector.load %arg9[%c8, %c0_24] : memref<64x384xf32, #tpu.memory_space<vmem>>, vector<8x384xf32>
    %cst_25 = arith.constant dense<0.000000e+00> : vector<8x384xf32>
    %49 = tpu.matmul %44, %11, %cst_25 {dimension_numbers = #tpu.dot_dimension_numbers<[1], [0], [0], [1], [0, 0, 1, 1], [], []>} : vector<8x128xf32>, vector<128x384xf32>, vector<8x384xf32> -> vector<8x384xf32>
    %50 = vector.extract_strided_slice %48 {offsets = [0, 0], sizes = [8, 128], strides = [1, 1]} : vector<8x384xf32> to vector<8x128xf32>
    %51 = vector.extract_strided_slice %49 {offsets = [0, 0], sizes = [8, 128], strides = [1, 1]} : vector<8x384xf32> to vector<8x128xf32>
    %52 = arith.addf %50, %51 : vector<8x128xf32>
    %53 = arith.negf %52 : vector<8x128xf32>
    %54 = math.exp %53 : vector<8x128xf32>
    %cst_26 = arith.constant 1.000000e+00 : f32
    %55 = vector.broadcast %cst_26 : f32 to vector<8x128xf32>
    %56 = arith.addf %55, %54 : vector<8x128xf32>
    %57 = arith.divf %55, %56 : vector<8x128xf32>
    %58 = vector.extract_strided_slice %48 {offsets = [0, 128], sizes = [8, 128], strides = [1, 1]} : vector<8x384xf32> to vector<8x128xf32>
    %59 = vector.extract_strided_slice %49 {offsets = [0, 128], sizes = [8, 128], strides = [1, 1]} : vector<8x384xf32> to vector<8x128xf32>
    %60 = arith.addf %58, %59 : vector<8x128xf32>
    %61 = arith.negf %60 : vector<8x128xf32>
    %62 = math.exp %61 : vector<8x128xf32>
    %cst_27 = arith.constant 1.000000e+00 : f32
    %63 = vector.broadcast %cst_27 : f32 to vector<8x128xf32>
    %64 = arith.addf %63, %62 : vector<8x128xf32>
    %65 = arith.divf %63, %64 : vector<8x128xf32>
    %66 = vector.extract_strided_slice %48 {offsets = [0, 256], sizes = [8, 128], strides = [1, 1]} : vector<8x384xf32> to vector<8x128xf32>
    %67 = vector.extract_strided_slice %49 {offsets = [0, 256], sizes = [8, 128], strides = [1, 1]} : vector<8x384xf32> to vector<8x128xf32>
    %68 = arith.addf %67, %14 : vector<8x128xf32>
    %69 = arith.mulf %57, %68 : vector<8x128xf32>
    %70 = arith.addf %66, %69 : vector<8x128xf32>
    %71 = math.tanh %70 : vector<8x128xf32>
    %cst_28 = arith.constant 1.000000e+00 : f32
    %72 = vector.broadcast %cst_28 : f32 to vector<8x128xf32>
    %73 = arith.subf %72, %65 : vector<8x128xf32>
    %74 = arith.mulf %73, %71 : vector<8x128xf32>
    %75 = arith.mulf %65, %44 : vector<8x128xf32>
    %76 = arith.addf %74, %75 : vector<8x128xf32>
    %c0_29 = arith.constant 0 : index
    %c8_30 = arith.constant 8 : index
    %c0_31 = arith.constant 0 : index
    %77 = vector.load %arg7[%c0_29, %c8_30, %c0_31] : memref<1x64x128xf32, #tpu.memory_space<vmem>>, vector<1x8x128xf32>
    %78 = vector.shape_cast %77 : vector<1x8x128xf32> to vector<8x128xf32>
    %79 = vector.shape_cast %76 : vector<8x128xf32> to vector<1x8x128xf32>
    tpu.vector_store %arg7[%c0_29, %c8_30, %c0_31], %79 {strides = array<i32>} : memref<1x64x128xf32, #tpu.memory_space<vmem>>, vector<1x8x128xf32>,
    %c16 = arith.constant 16 : index
    %c0_32 = arith.constant 0 : index
    %80 = vector.load %arg9[%c16, %c0_32] : memref<64x384xf32, #tpu.memory_space<vmem>>, vector<8x384xf32>
    %cst_33 = arith.constant dense<0.000000e+00> : vector<8x384xf32>
    %81 = tpu.matmul %76, %11, %cst_33 {dimension_numbers = #tpu.dot_dimension_numbers<[1], [0], [0], [1], [0, 0, 1, 1], [], []>} : vector<8x128xf32>, vector<128x384xf32>, vector<8x384xf32> -> vector<8x384xf32>
    %82 = vector.extract_strided_slice %80 {offsets = [0, 0], sizes = [8, 128], strides = [1, 1]} : vector<8x384xf32> to vector<8x128xf32>
    %83 = vector.extract_strided_slice %81 {offsets = [0, 0], sizes = [8, 128], strides = [1, 1]} : vector<8x384xf32> to vector<8x128xf32>
    %84 = arith.addf %82, %83 : vector<8x128xf32>
    %85 = arith.negf %84 : vector<8x128xf32>
    %86 = math.exp %85 : vector<8x128xf32>
    %cst_34 = arith.constant 1.000000e+00 : f32
    %87 = vector.broadcast %cst_34 : f32 to vector<8x128xf32>
    %88 = arith.addf %87, %86 : vector<8x128xf32>
    %89 = arith.divf %87, %88 : vector<8x128xf32>
    %90 = vector.extract_strided_slice %80 {offsets = [0, 128], sizes = [8, 128], strides = [1, 1]} : vector<8x384xf32> to vector<8x128xf32>
    %91 = vector.extract_strided_slice %81 {offsets = [0, 128], sizes = [8, 128], strides = [1, 1]} : vector<8x384xf32> to vector<8x128xf32>
    %92 = arith.addf %90, %91 : vector<8x128xf32>
    %93 = arith.negf %92 : vector<8x128xf32>
    %94 = math.exp %93 : vector<8x128xf32>
    %cst_35 = arith.constant 1.000000e+00 : f32
    %95 = vector.broadcast %cst_35 : f32 to vector<8x128xf32>
    %96 = arith.addf %95, %94 : vector<8x128xf32>
    %97 = arith.divf %95, %96 : vector<8x128xf32>
    %98 = vector.extract_strided_slice %80 {offsets = [0, 256], sizes = [8, 128], strides = [1, 1]} : vector<8x384xf32> to vector<8x128xf32>
    %99 = vector.extract_strided_slice %81 {offsets = [0, 256], sizes = [8, 128], strides = [1, 1]} : vector<8x384xf32> to vector<8x128xf32>
    %100 = arith.addf %99, %14 : vector<8x128xf32>
    %101 = arith.mulf %89, %100 : vector<8x128xf32>
    %102 = arith.addf %98, %101 : vector<8x128xf32>
    %103 = math.tanh %102 : vector<8x128xf32>
    %cst_36 = arith.constant 1.000000e+00 : f32
    %104 = vector.broadcast %cst_36 : f32 to vector<8x128xf32>
    %105 = arith.subf %104, %97 : vector<8x128xf32>
    %106 = arith.mulf %105, %103 : vector<8x128xf32>
    %107 = arith.mulf %97, %76 : vector<8x128xf32>
    %108 = arith.addf %106, %107 : vector<8x128xf32>
    %c0_37 = arith.constant 0 : index
    %c16_38 = arith.constant 16 : index
    %c0_39 = arith.constant 0 : index
    %109 = vector.load %arg7[%c0_37, %c16_38, %c0_39] : memref<1x64x128xf32, #tpu.memory_space<vmem>>, vector<1x8x128xf32>
    %110 = vector.shape_cast %109 : vector<1x8x128xf32> to vector<8x128xf32>
    %111 = vector.shape_cast %108 : vector<8x128xf32> to vector<1x8x128xf32>
    tpu.vector_store %arg7[%c0_37, %c16_38, %c0_39], %111 {strides = array<i32>} : memref<1x64x128xf32, #tpu.memory_space<vmem>>, vector<1x8x128xf32>,
    %c24 = arith.constant 24 : index
    %c0_40 = arith.constant 0 : index
    %112 = vector.load %arg9[%c24, %c0_40] : memref<64x384xf32, #tpu.memory_space<vmem>>, vector<8x384xf32>
    %cst_41 = arith.constant dense<0.000000e+00> : vector<8x384xf32>
    %113 = tpu.matmul %108, %11, %cst_41 {dimension_numbers = #tpu.dot_dimension_numbers<[1], [0], [0], [1], [0, 0, 1, 1], [], []>} : vector<8x128xf32>, vector<128x384xf32>, vector<8x384xf32> -> vector<8x384xf32>
    %114 = vector.extract_strided_slice %112 {offsets = [0, 0], sizes = [8, 128], strides = [1, 1]} : vector<8x384xf32> to vector<8x128xf32>
    %115 = vector.extract_strided_slice %113 {offsets = [0, 0], sizes = [8, 128], strides = [1, 1]} : vector<8x384xf32> to vector<8x128xf32>
    %116 = arith.addf %114, %115 : vector<8x128xf32>
    %117 = arith.negf %116 : vector<8x128xf32>
    %118 = math.exp %117 : vector<8x128xf32>
    %cst_42 = arith.constant 1.000000e+00 : f32
    %119 = vector.broadcast %cst_42 : f32 to vector<8x128xf32>
    %120 = arith.addf %119, %118 : vector<8x128xf32>
    %121 = arith.divf %119, %120 : vector<8x128xf32>
    %122 = vector.extract_strided_slice %112 {offsets = [0, 128], sizes = [8, 128], strides = [1, 1]} : vector<8x384xf32> to vector<8x128xf32>
    %123 = vector.extract_strided_slice %113 {offsets = [0, 128], sizes = [8, 128], strides = [1, 1]} : vector<8x384xf32> to vector<8x128xf32>
    %124 = arith.addf %122, %123 : vector<8x128xf32>
    %125 = arith.negf %124 : vector<8x128xf32>
    %126 = math.exp %125 : vector<8x128xf32>
    %cst_43 = arith.constant 1.000000e+00 : f32
    %127 = vector.broadcast %cst_43 : f32 to vector<8x128xf32>
    %128 = arith.addf %127, %126 : vector<8x128xf32>
    %129 = arith.divf %127, %128 : vector<8x128xf32>
    %130 = vector.extract_strided_slice %112 {offsets = [0, 256], sizes = [8, 128], strides = [1, 1]} : vector<8x384xf32> to vector<8x128xf32>
    %131 = vector.extract_strided_slice %113 {offsets = [0, 256], sizes = [8, 128], strides = [1, 1]} : vector<8x384xf32> to vector<8x128xf32>
    %132 = arith.addf %131, %14 : vector<8x128xf32>
    %133 = arith.mulf %121, %132 : vector<8x128xf32>
    %134 = arith.addf %130, %133 : vector<8x128xf32>
    %135 = math.tanh %134 : vector<8x128xf32>
    %cst_44 = arith.constant 1.000000e+00 : f32
    %136 = vector.broadcast %cst_44 : f32 to vector<8x128xf32>
    %137 = arith.subf %136, %129 : vector<8x128xf32>
    %138 = arith.mulf %137, %135 : vector<8x128xf32>
    %139 = arith.mulf %129, %108 : vector<8x128xf32>
    %140 = arith.addf %138, %139 : vector<8x128xf32>
    %c0_45 = arith.constant 0 : index
    %c24_46 = arith.constant 24 : index
    %c0_47 = arith.constant 0 : index
    %141 = vector.load %arg7[%c0_45, %c24_46, %c0_47] : memref<1x64x128xf32, #tpu.memory_space<vmem>>, vector<1x8x128xf32>
    %142 = vector.shape_cast %141 : vector<1x8x128xf32> to vector<8x128xf32>
    %143 = vector.shape_cast %140 : vector<8x128xf32> to vector<1x8x128xf32>
    tpu.vector_store %arg7[%c0_45, %c24_46, %c0_47], %143 {strides = array<i32>} : memref<1x64x128xf32, #tpu.memory_space<vmem>>, vector<1x8x128xf32>,
    %c32 = arith.constant 32 : index
    %c0_48 = arith.constant 0 : index
    %144 = vector.load %arg9[%c32, %c0_48] : memref<64x384xf32, #tpu.memory_space<vmem>>, vector<8x384xf32>
    %cst_49 = arith.constant dense<0.000000e+00> : vector<8x384xf32>
    %145 = tpu.matmul %140, %11, %cst_49 {dimension_numbers = #tpu.dot_dimension_numbers<[1], [0], [0], [1], [0, 0, 1, 1], [], []>} : vector<8x128xf32>, vector<128x384xf32>, vector<8x384xf32> -> vector<8x384xf32>
    %146 = vector.extract_strided_slice %144 {offsets = [0, 0], sizes = [8, 128], strides = [1, 1]} : vector<8x384xf32> to vector<8x128xf32>
    %147 = vector.extract_strided_slice %145 {offsets = [0, 0], sizes = [8, 128], strides = [1, 1]} : vector<8x384xf32> to vector<8x128xf32>
    %148 = arith.addf %146, %147 : vector<8x128xf32>
    %149 = arith.negf %148 : vector<8x128xf32>
    %150 = math.exp %149 : vector<8x128xf32>
    %cst_50 = arith.constant 1.000000e+00 : f32
    %151 = vector.broadcast %cst_50 : f32 to vector<8x128xf32>
    %152 = arith.addf %151, %150 : vector<8x128xf32>
    %153 = arith.divf %151, %152 : vector<8x128xf32>
    %154 = vector.extract_strided_slice %144 {offsets = [0, 128], sizes = [8, 128], strides = [1, 1]} : vector<8x384xf32> to vector<8x128xf32>
    %155 = vector.extract_strided_slice %145 {offsets = [0, 128], sizes = [8, 128], strides = [1, 1]} : vector<8x384xf32> to vector<8x128xf32>
    %156 = arith.addf %154, %155 : vector<8x128xf32>
    %157 = arith.negf %156 : vector<8x128xf32>
    %158 = math.exp %157 : vector<8x128xf32>
    %cst_51 = arith.constant 1.000000e+00 : f32
    %159 = vector.broadcast %cst_51 : f32 to vector<8x128xf32>
    %160 = arith.addf %159, %158 : vector<8x128xf32>
    %161 = arith.divf %159, %160 : vector<8x128xf32>
    %162 = vector.extract_strided_slice %144 {offsets = [0, 256], sizes = [8, 128], strides = [1, 1]} : vector<8x384xf32> to vector<8x128xf32>
    %163 = vector.extract_strided_slice %145 {offsets = [0, 256], sizes = [8, 128], strides = [1, 1]} : vector<8x384xf32> to vector<8x128xf32>
    %164 = arith.addf %163, %14 : vector<8x128xf32>
    %165 = arith.mulf %153, %164 : vector<8x128xf32>
    %166 = arith.addf %162, %165 : vector<8x128xf32>
    %167 = math.tanh %166 : vector<8x128xf32>
    %cst_52 = arith.constant 1.000000e+00 : f32
    %168 = vector.broadcast %cst_52 : f32 to vector<8x128xf32>
    %169 = arith.subf %168, %161 : vector<8x128xf32>
    %170 = arith.mulf %169, %167 : vector<8x128xf32>
    %171 = arith.mulf %161, %140 : vector<8x128xf32>
    %172 = arith.addf %170, %171 : vector<8x128xf32>
    %c0_53 = arith.constant 0 : index
    %c32_54 = arith.constant 32 : index
    %c0_55 = arith.constant 0 : index
    %173 = vector.load %arg7[%c0_53, %c32_54, %c0_55] : memref<1x64x128xf32, #tpu.memory_space<vmem>>, vector<1x8x128xf32>
    %174 = vector.shape_cast %173 : vector<1x8x128xf32> to vector<8x128xf32>
    %175 = vector.shape_cast %172 : vector<8x128xf32> to vector<1x8x128xf32>
    tpu.vector_store %arg7[%c0_53, %c32_54, %c0_55], %175 {strides = array<i32>} : memref<1x64x128xf32, #tpu.memory_space<vmem>>, vector<1x8x128xf32>,
    %c40 = arith.constant 40 : index
    %c0_56 = arith.constant 0 : index
    %176 = vector.load %arg9[%c40, %c0_56] : memref<64x384xf32, #tpu.memory_space<vmem>>, vector<8x384xf32>
    %cst_57 = arith.constant dense<0.000000e+00> : vector<8x384xf32>
    %177 = tpu.matmul %172, %11, %cst_57 {dimension_numbers = #tpu.dot_dimension_numbers<[1], [0], [0], [1], [0, 0, 1, 1], [], []>} : vector<8x128xf32>, vector<128x384xf32>, vector<8x384xf32> -> vector<8x384xf32>
    %178 = vector.extract_strided_slice %176 {offsets = [0, 0], sizes = [8, 128], strides = [1, 1]} : vector<8x384xf32> to vector<8x128xf32>
    %179 = vector.extract_strided_slice %177 {offsets = [0, 0], sizes = [8, 128], strides = [1, 1]} : vector<8x384xf32> to vector<8x128xf32>
    %180 = arith.addf %178, %179 : vector<8x128xf32>
    %181 = arith.negf %180 : vector<8x128xf32>
    %182 = math.exp %181 : vector<8x128xf32>
    %cst_58 = arith.constant 1.000000e+00 : f32
    %183 = vector.broadcast %cst_58 : f32 to vector<8x128xf32>
    %184 = arith.addf %183, %182 : vector<8x128xf32>
    %185 = arith.divf %183, %184 : vector<8x128xf32>
    %186 = vector.extract_strided_slice %176 {offsets = [0, 128], sizes = [8, 128], strides = [1, 1]} : vector<8x384xf32> to vector<8x128xf32>
    %187 = vector.extract_strided_slice %177 {offsets = [0, 128], sizes = [8, 128], strides = [1, 1]} : vector<8x384xf32> to vector<8x128xf32>
    %188 = arith.addf %186, %187 : vector<8x128xf32>
    %189 = arith.negf %188 : vector<8x128xf32>
    %190 = math.exp %189 : vector<8x128xf32>
    %cst_59 = arith.constant 1.000000e+00 : f32
    %191 = vector.broadcast %cst_59 : f32 to vector<8x128xf32>
    %192 = arith.addf %191, %190 : vector<8x128xf32>
    %193 = arith.divf %191, %192 : vector<8x128xf32>
    %194 = vector.extract_strided_slice %176 {offsets = [0, 256], sizes = [8, 128], strides = [1, 1]} : vector<8x384xf32> to vector<8x128xf32>
    %195 = vector.extract_strided_slice %177 {offsets = [0, 256], sizes = [8, 128], strides = [1, 1]} : vector<8x384xf32> to vector<8x128xf32>
    %196 = arith.addf %195, %14 : vector<8x128xf32>
    %197 = arith.mulf %185, %196 : vector<8x128xf32>
    %198 = arith.addf %194, %197 : vector<8x128xf32>
    %199 = math.tanh %198 : vector<8x128xf32>
    %cst_60 = arith.constant 1.000000e+00 : f32
    %200 = vector.broadcast %cst_60 : f32 to vector<8x128xf32>
    %201 = arith.subf %200, %193 : vector<8x128xf32>
    %202 = arith.mulf %201, %199 : vector<8x128xf32>
    %203 = arith.mulf %193, %172 : vector<8x128xf32>
    %204 = arith.addf %202, %203 : vector<8x128xf32>
    %c0_61 = arith.constant 0 : index
    %c40_62 = arith.constant 40 : index
    %c0_63 = arith.constant 0 : index
    %205 = vector.load %arg7[%c0_61, %c40_62, %c0_63] : memref<1x64x128xf32, #tpu.memory_space<vmem>>, vector<1x8x128xf32>
    %206 = vector.shape_cast %205 : vector<1x8x128xf32> to vector<8x128xf32>
    %207 = vector.shape_cast %204 : vector<8x128xf32> to vector<1x8x128xf32>
    tpu.vector_store %arg7[%c0_61, %c40_62, %c0_63], %207 {strides = array<i32>} : memref<1x64x128xf32, #tpu.memory_space<vmem>>, vector<1x8x128xf32>,
    %c48 = arith.constant 48 : index
    %c0_64 = arith.constant 0 : index
    %208 = vector.load %arg9[%c48, %c0_64] : memref<64x384xf32, #tpu.memory_space<vmem>>, vector<8x384xf32>
    %cst_65 = arith.constant dense<0.000000e+00> : vector<8x384xf32>
    %209 = tpu.matmul %204, %11, %cst_65 {dimension_numbers = #tpu.dot_dimension_numbers<[1], [0], [0], [1], [0, 0, 1, 1], [], []>} : vector<8x128xf32>, vector<128x384xf32>, vector<8x384xf32> -> vector<8x384xf32>
    %210 = vector.extract_strided_slice %208 {offsets = [0, 0], sizes = [8, 128], strides = [1, 1]} : vector<8x384xf32> to vector<8x128xf32>
    %211 = vector.extract_strided_slice %209 {offsets = [0, 0], sizes = [8, 128], strides = [1, 1]} : vector<8x384xf32> to vector<8x128xf32>
    %212 = arith.addf %210, %211 : vector<8x128xf32>
    %213 = arith.negf %212 : vector<8x128xf32>
    %214 = math.exp %213 : vector<8x128xf32>
    %cst_66 = arith.constant 1.000000e+00 : f32
    %215 = vector.broadcast %cst_66 : f32 to vector<8x128xf32>
    %216 = arith.addf %215, %214 : vector<8x128xf32>
    %217 = arith.divf %215, %216 : vector<8x128xf32>
    %218 = vector.extract_strided_slice %208 {offsets = [0, 128], sizes = [8, 128], strides = [1, 1]} : vector<8x384xf32> to vector<8x128xf32>
    %219 = vector.extract_strided_slice %209 {offsets = [0, 128], sizes = [8, 128], strides = [1, 1]} : vector<8x384xf32> to vector<8x128xf32>
    %220 = arith.addf %218, %219 : vector<8x128xf32>
    %221 = arith.negf %220 : vector<8x128xf32>
    %222 = math.exp %221 : vector<8x128xf32>
    %cst_67 = arith.constant 1.000000e+00 : f32
    %223 = vector.broadcast %cst_67 : f32 to vector<8x128xf32>
    %224 = arith.addf %223, %222 : vector<8x128xf32>
    %225 = arith.divf %223, %224 : vector<8x128xf32>
    %226 = vector.extract_strided_slice %208 {offsets = [0, 256], sizes = [8, 128], strides = [1, 1]} : vector<8x384xf32> to vector<8x128xf32>
    %227 = vector.extract_strided_slice %209 {offsets = [0, 256], sizes = [8, 128], strides = [1, 1]} : vector<8x384xf32> to vector<8x128xf32>
    %228 = arith.addf %227, %14 : vector<8x128xf32>
    %229 = arith.mulf %217, %228 : vector<8x128xf32>
    %230 = arith.addf %226, %229 : vector<8x128xf32>
    %231 = math.tanh %230 : vector<8x128xf32>
    %cst_68 = arith.constant 1.000000e+00 : f32
    %232 = vector.broadcast %cst_68 : f32 to vector<8x128xf32>
    %233 = arith.subf %232, %225 : vector<8x128xf32>
    %234 = arith.mulf %233, %231 : vector<8x128xf32>
    %235 = arith.mulf %225, %204 : vector<8x128xf32>
    %236 = arith.addf %234, %235 : vector<8x128xf32>
    %c0_69 = arith.constant 0 : index
    %c48_70 = arith.constant 48 : index
    %c0_71 = arith.constant 0 : index
    %237 = vector.load %arg7[%c0_69, %c48_70, %c0_71] : memref<1x64x128xf32, #tpu.memory_space<vmem>>, vector<1x8x128xf32>
    %238 = vector.shape_cast %237 : vector<1x8x128xf32> to vector<8x128xf32>
    %239 = vector.shape_cast %236 : vector<8x128xf32> to vector<1x8x128xf32>
    tpu.vector_store %arg7[%c0_69, %c48_70, %c0_71], %239 {strides = array<i32>} : memref<1x64x128xf32, #tpu.memory_space<vmem>>, vector<1x8x128xf32>,
    %c56 = arith.constant 56 : index
    %c0_72 = arith.constant 0 : index
    %240 = vector.load %arg9[%c56, %c0_72] : memref<64x384xf32, #tpu.memory_space<vmem>>, vector<8x384xf32>
    %cst_73 = arith.constant dense<0.000000e+00> : vector<8x384xf32>
    %241 = tpu.matmul %236, %11, %cst_73 {dimension_numbers = #tpu.dot_dimension_numbers<[1], [0], [0], [1], [0, 0, 1, 1], [], []>} : vector<8x128xf32>, vector<128x384xf32>, vector<8x384xf32> -> vector<8x384xf32>
    %242 = vector.extract_strided_slice %240 {offsets = [0, 0], sizes = [8, 128], strides = [1, 1]} : vector<8x384xf32> to vector<8x128xf32>
    %243 = vector.extract_strided_slice %241 {offsets = [0, 0], sizes = [8, 128], strides = [1, 1]} : vector<8x384xf32> to vector<8x128xf32>
    %244 = arith.addf %242, %243 : vector<8x128xf32>
    %245 = arith.negf %244 : vector<8x128xf32>
    %246 = math.exp %245 : vector<8x128xf32>
    %cst_74 = arith.constant 1.000000e+00 : f32
    %247 = vector.broadcast %cst_74 : f32 to vector<8x128xf32>
    %248 = arith.addf %247, %246 : vector<8x128xf32>
    %249 = arith.divf %247, %248 : vector<8x128xf32>
    %250 = vector.extract_strided_slice %240 {offsets = [0, 128], sizes = [8, 128], strides = [1, 1]} : vector<8x384xf32> to vector<8x128xf32>
    %251 = vector.extract_strided_slice %241 {offsets = [0, 128], sizes = [8, 128], strides = [1, 1]} : vector<8x384xf32> to vector<8x128xf32>
    %252 = arith.addf %250, %251 : vector<8x128xf32>
    %253 = arith.negf %252 : vector<8x128xf32>
    %254 = math.exp %253 : vector<8x128xf32>
    %cst_75 = arith.constant 1.000000e+00 : f32
    %255 = vector.broadcast %cst_75 : f32 to vector<8x128xf32>
    %256 = arith.addf %255, %254 : vector<8x128xf32>
    %257 = arith.divf %255, %256 : vector<8x128xf32>
    %258 = vector.extract_strided_slice %240 {offsets = [0, 256], sizes = [8, 128], strides = [1, 1]} : vector<8x384xf32> to vector<8x128xf32>
    %259 = vector.extract_strided_slice %241 {offsets = [0, 256], sizes = [8, 128], strides = [1, 1]} : vector<8x384xf32> to vector<8x128xf32>
    %260 = arith.addf %259, %14 : vector<8x128xf32>
    %261 = arith.mulf %249, %260 : vector<8x128xf32>
    %262 = arith.addf %258, %261 : vector<8x128xf32>
    %263 = math.tanh %262 : vector<8x128xf32>
    %cst_76 = arith.constant 1.000000e+00 : f32
    %264 = vector.broadcast %cst_76 : f32 to vector<8x128xf32>
    %265 = arith.subf %264, %257 : vector<8x128xf32>
    %266 = arith.mulf %265, %263 : vector<8x128xf32>
    %267 = arith.mulf %257, %236 : vector<8x128xf32>
    %268 = arith.addf %266, %267 : vector<8x128xf32>
    %c0_77 = arith.constant 0 : index
    %c56_78 = arith.constant 56 : index
    %c0_79 = arith.constant 0 : index
    %269 = vector.load %arg7[%c0_77, %c56_78, %c0_79] : memref<1x64x128xf32, #tpu.memory_space<vmem>>, vector<1x8x128xf32>
    %270 = vector.shape_cast %269 : vector<1x8x128xf32> to vector<8x128xf32>
    %271 = vector.shape_cast %268 : vector<8x128xf32> to vector<1x8x128xf32>
    tpu.vector_store %arg7[%c0_77, %c56_78, %c0_79], %271 {strides = array<i32>} : memref<1x64x128xf32, #tpu.memory_space<vmem>>, vector<1x8x128xf32>,
    %c0_80 = arith.constant 0 : index
    %c0_81 = arith.constant 0 : index
    %272 = vector.load %arg8[%c0_80, %c0_81] : memref<8x128xf32, #tpu.memory_space<vmem>>, vector<8x128xf32>
    tpu.vector_store %arg8[%c0_80, %c0_81], %268 {strides = array<i32>} : memref<8x128xf32, #tpu.memory_space<vmem>>, vector<8x128xf32>,
    return
  }
  func.func @transform_0(%arg0: i32, %arg1: i32) -> (i32, i32, i32) {
    %c0_i32 = arith.constant 0 : i32
    %c0_i32_0 = arith.constant 0 : i32
    return %arg0, %arg1, %c0_i32 : i32, i32, i32
  }
  func.func @transform_1(%arg0: i32, %arg1: i32) -> (i32, i32) {
    %c0_i32 = arith.constant 0 : i32
    %c0_i32_0 = arith.constant 0 : i32
    %c0_i32_1 = arith.constant 0 : i32
    return %c0_i32, %c0_i32_0 : i32, i32
  }
  func.func @transform_2(%arg0: i32, %arg1: i32) -> (i32, i32) {
    %c0_i32 = arith.constant 0 : i32
    %c0_i32_0 = arith.constant 0 : i32
    %c0_i32_1 = arith.constant 0 : i32
    return %c0_i32, %c0_i32_0 : i32, i32
  }
  func.func @transform_3(%arg0: i32, %arg1: i32) -> (i32, i32) {
    %c0_i32 = arith.constant 0 : i32
    %c0_i32_0 = arith.constant 0 : i32
    %c0_i32_1 = arith.constant 0 : i32
    return %c0_i32, %c0_i32_0 : i32, i32
  }
  func.func @transform_4(%arg0: i32, %arg1: i32) -> (i32, i32) {
    %c0_i32 = arith.constant 0 : i32
    %c0_i32_0 = arith.constant 0 : i32
    %c0_i32_1 = arith.constant 0 : i32
    return %c0_i32, %c0_i32_0 : i32, i32
  }
  func.func @transform_5(%arg0: i32, %arg1: i32) -> (i32, i32, i32) {
    %c0_i32 = arith.constant 0 : i32
    %c0_i32_0 = arith.constant 0 : i32
    return %arg0, %arg1, %c0_i32 : i32, i32, i32
  }
}

</mosaic_0001>

<bundles_post_ra>
// kernel: tpu_custom_call.1
= control target key start
LH: loop header
LB: loop body
LE: loop exit
PB: predicated region body
PF: predicated region fallthrough
CT: control target
= control target key end

     0   :  { %10 = vsyncpa [#allocation5], 0  ;;  %s3112_s0 = inlined_call_operand.vmem [shape: f32[2,192,32], index: 0, kind: input, shape index: {}]   ;;  %s3113_s1 = inlined_call_operand.vmem [shape: f32[32,384], index: 1, kind: input, shape index: {}]   ;;  %s3114_s2 = inlined_call_operand.vmem [shape: f32[128,384], index: 2, kind: input, shape index: {}]   ;;  %s3115_s3 = inlined_call_operand.vmem [shape: f32[1,384], index: 3, kind: input, shape index: {}]   ;;  %s3116_s4 = inlined_call_operand.vmem [shape: f32[1,128], index: 4, kind: input, shape index: {}]   ;;  %s3117_s5 = inlined_call_operand.hbm [shape: f32[2,192,128], index: 5, kind: output, shape index: {}]  }
   0x1   :  { %12 = vsyncpa [#allocation5 + $0x1], 0  ;;  %s1906_s18 = smov 0   ;;  %s1908_s19 = smov 0  }
   0x2   :  { %s1910_s20 = smov 0   ;;  %s1912_s21 = smov 0  }
   0x3   :  { %s1914_s22 = smov 0   ;;  %s1916_s23 = smov 0  }
   0x4   :  { %s1918_s24 = smov 0   ;;  %s1920_s25 = smov 0  }
   0x5 LB: > { %s1509_s26 = sadd.s32 4294967295, %s1871_s25   ;;  %s1510_s27 = sadd.s32 4294967294, %s1871_s25   ;;  %s1871_s25 = sphi %s1920_s25, %s18_s25   ;;  %s1867_s24 = sphi %s1918_s24, %s3217_s24   ;;  %s1863_s23 = sphi %s1916_s23, %s3216_s23   ;;  %s1859_s22 = sphi %s1914_s22, %s3215_s22   ;;  %s1855_s21 = sphi %s1912_s21, %s3214_s21   ;;  %s1851_s20 = sphi %s1910_s20, %s3213_s20   ;;  %s1847_s19 = sphi %s1908_s19, %s3212_s19   ;;  %s1843_s18 = sphi %s1906_s18, %s3211_s18  }
   0x6   : > { %s27_s28 = sadd.s32 1, %s1863_s23  ;;  %s30_s29 = sadd.s32 1, %s1867_s24 }
   0x7   : > { %p28_p0 = scmp.ge.s32.totalorder %s27_s28, 3  ;;  %p161_p1 = scmp.ne.s32.totalorder %s1851_s20, %s1847_s19 }
   0x8   : > { %p162_p2 = scmp.eq.s32.totalorder %s1509_s26, 5  ;;  %p167_p5 = scmp.ne.s32.totalorder %s1847_s19, %s1843_s18 }
   0x9   : > { %s3219_s28 = smov (%p28_p0, %s27_s28), 0  ;;  %s3221_s29 = smov (!%p28_p0, %s30_s29), %s1867_s24 }
   0xa   : > { %s147_s30 = ssub.s32 %s1863_s23, %s3219_s28  ;;  %p1957_p3 = por %p162_p2, %p161_p1 }
   0xb   : > { %p32_p4 = scmp.ge.s32.totalorder %s3221_s29, 2  ;;  %p168_p6 = scmp.eq.s32.totalorder %s1510_s27, 5 }
   0xc   : > { %p1513_p7 = scmp.ge.s32.totalorder %s1871_s25, 1  ;;  %p211_p9 = scmp.lt.s32.totalorder %s1871_s25, 7 }
   0xd   : > { %s3223_s29 = smov (%p32_p4, %s3221_s29), 0  ;;  %p1966_p8 = por %p168_p6, %p167_p5 }
   0xe   : > { %3140 = sst [smem:[#allocation7_spill]] %s3223_s29  ;;  %s146_s8 = ssub.s32 %s1867_s24, %s3223_s29 }
   0xf   : > { %s151_s9 = sadd.s32 1, %s1851_s20  ;;  %s148_s10 = sor.u32 %s147_s30, %s146_s8 }
  0x10   : > { %p212_p10 = pnand %p1513_p7, %p211_p9  ;;  %p149_p11 = scmp.eq.s32.totalorder %s148_s10, 0 }
  0x12   : > { %s1975_s11 = scalar_select %p149_p11, %s1851_s20, %s151_s9  }
  0x13   : > { %215 = sbr.rel (%p212_p10) target bundleno = 1490 (0x5d2), region = 40 }
  0x18   : > { %s3118_s12 = sand.u32 1, %s1847_s19   ;;  %s1979_s13 = sshll.u32 %s1855_s21, 3 }
  0x19   : > { %s1514_s14 = sshll.u32 %s3118_s12, 6  ;;  %p244_p12 = scmp.lt.s32.totalorder %s1859_s22, 1 }
  0x1a   : > { %p246_p13 = scmp.lt.s32.totalorder %s1979_s13, 23  ;;  %s1992_s10 = scalar_lea.vmem [#allocation4], %s1514_s14 }
  0x1b   : > { %s245_s15 = scalar_select %p244_p12, %s1859_s22, 1 }
  0x1c   : > { %s247_s16 = scalar_select %p246_p13, %s1979_s13, 23 }
  0x1d   : > { %s1571_s17 = smul.u32 24, %s245_s15  ;;  %p1517_p0 = scmp.ne.s32.totalorder %s1855_s21, 0 }
  0x1f   : > { %s249_s26 = sadd.s32 %s1571_s17, %s247_s16  ;;  %257 = sbr.rel (%p1517_p0) target bundleno = 38 (0x26), region = 44 }
  0x20   : > { %s1516_s27 = sshll.u32 %s249_s26, 3 }
  0x21   : > { %s1990_s9 = scalar_lea.vmem %s3112_s0, %s1516_s27 }
  0x24   : > { %v1873_v0 = vmov 0.0  }
  0x25   : > { %258 = vst [vmem:[#allocation2] sm:$0xff] %v1873_v0 }
  0x26 PF: > { %v1998_v1 = vld [vmem:[%s3114_s2 + $0x168] sm:$0xff]  ;;  %v2006_v3 = vld [vmem:[%s3114_s2 + $0x150] sm:$0xff]  ;;  %v2015_v5 = vld [vmem:[%s3114_s2 + $0x138] sm:$0xff]  ;;  %vm287_vm0 = vcmask 261120   ;;  %s1424_s29 = sshll.u32 %s1992_s10, 4  ;;  %s3209_s12 = sand.u32 1, %s1847_s19   ;;  %s1425_s29 = int_to_ptr.vmem [resolvable:$true] %s1424_s29 }
  0x27   : > { %v276_v2 = vld [vmem:[%s3113_s1 + $0x48] sm:$0xff]  ;;  %515 = vmatpush.msra.mxu3 %v1998_v1  ;;  %v273_v4 = vld [vmem:[%s3113_s1 + $0x30] sm:$0xff]  ;;  %v270_v6 = vld [vmem:[%s3113_s1 + $0x18] sm:$0xff]  ;;  %s1410_s27 = scalar_lea.sflag [#allocation5], %s3209_s12 }
  0x28   : > { %324 = vmatpush.msra.mxu0 %v276_v2  ;;  %1563 = vmatpush.msra.mxu2 %v276_v2  ;;  %v2024_v7 = vld [vmem:[%s3114_s2 + $0x120] sm:$0xff]  ;;  %v2036_v10 = vld [vmem:[%s3114_s2 + $0x108] sm:$0xff]  ;;  %v2044_v11 = vld [vmem:[%s3114_s2 + $0xf0] sm:$0xff] }
  0x29   : > { %516 = vmatpush.msra.mxu3 %v2006_v3  ;;  %v267_v8 = vld [vmem:[%s3113_s1] sm:$0xff]  ;;  %v2049_v12 = vld [vmem:[%s3114_s2 + $0x178] sm:$0xff]  ;;  %v2066_v15 = vld [vmem:[%s3114_s2 + $0x148] sm:$0xff] }
  0x2a   : > { %325 = vmatpush.msra.mxu0 %v273_v4  ;;  %1564 = vmatpush.msra.mxu2 %v273_v4  ;;  %v2031_v9 = vld [vmem:[%s1990_s9] sm:$0xff]  ;;  %v2061_v14 = vld [vmem:[%s3114_s2 + $0xd8] sm:$0xff]  ;;  %v2078_v17 = vld [vmem:[%s3114_s2 + $0x130] sm:$0xff] }
  0x2b   : > { %517 = vmatpush.msra.mxu3 %v2015_v5  ;;  %v2056_v13 = vld [vmem:[%s3114_s2 + $0x160] sm:$0xff]  ;;  %v2082_v18 = vld [vmem:[%s1990_s9 + $0x8] sm:$0xff]  ;;  %v2086_v19 = vld [vmem:[%s1990_s9 + $0x38] sm:$0xff] }
  0x2c   : > { %326 = vmatpush.msra.mxu0 %v270_v6  ;;  %1565 = vmatpush.msra.mxu2 %v270_v6  ;;  %v2073_v16 = vld [vmem:[%s3114_s2 + $0xc0] sm:$0xff]  ;;  %v2091_v20 = vld [vmem:[%s3114_s2 + $0xa8] sm:$0xff]  ;;  %v2096_v21 = vld [vmem:[%s3114_s2 + $0x118] sm:$0xff] }
  0x2d   : > { %518 = vmatpush.msra.mxu3 %v2024_v7  ;;  %v277_v22 = vld [vmem:[%s3113_s1 + $0x50] sm:$0xff]  ;;  %v2115_v24 = vld [vmem:[%s3114_s2 + $0x100] sm:$0xff]  ;;  %v274_v25 = vld [vmem:[%s3113_s1 + $0x38] sm:$0xff] }
  0x2e   : > { %327 = vmatpush.msra.mxu0 %v267_v8  ;;  %1566 = vmatpush.msra.mxu2 %v267_v8  ;;  %v2110_v23 = vld [vmem:[%s3114_s2 + $0x90] sm:$0xff]  ;;  %v2125_v26 = vld [vmem:[%s3114_s2 + $0x78] sm:$0xff]  ;;  %v2130_v27 = vld [vmem:[%s3114_s2 + $0xe8] sm:$0xff] }
  0x2f   : > { %1518 = vmatmul.msk.f32.vlgmr.msra.gmra.mxu0 %vm287_vm0, %v2031_v9  ;;  %519 = vmatpush.msra.mxu3 %v2036_v10  ;;  %v271_v28 = vld [vmem:[%s3113_s1 + $0x20] sm:$0xff]  ;;  %v2145_v30 = vld [vmem:[%s3114_s2 + $0xd0] sm:$0xff]  ;;  %v268_v32 = vld [vmem:[%s3113_s1 + $0x8] sm:$0xff] }
  0x30   : > { %555 = vmatpush.msrb.mxu0 %v2049_v12  ;;  %1525 = vmatmul.msk.f32.vlgmr.msra.gmra.mxu2 %vm287_vm0, %v2086_v19  ;;  %v2140_v29 = vld [vmem:[%s3114_s2 + $0x60] sm:$0xff]  ;;  %v2149_v31 = vld [vmem:[%s1990_s9 + $0x10] sm:$0xff]  ;;  %v2158_v33 = vld [vmem:[%s3114_s2 + $0x48] sm:$0xff] }
  0x31   : > { %520 = vmatpush.msra.mxu3 %v2044_v11  ;;  %1567 = vmatpush.msrb.mxu2 %v277_v22  ;;  %v2163_v34 = vld [vmem:[%s3114_s2 + $0xb8] sm:$0xff]  ;;  %v2175_v36 = vld [vmem:[%s3114_s2 + $0x30] sm:$0xff]  ;;  %v2180_v37 = vld [vmem:[%s3114_s2 + $0xa0] sm:$0xff] }
  0x32   : > { %556 = vmatpush.msrb.mxu0 %v2056_v13  ;;  %365 = vmatpush.msra.mxu1 %v277_v22  ;;  %v278_v35 = vld [vmem:[%s3113_s1 + $0x58] sm:$0xff]  ;;  %3142 = vst [vmem:[#allocation8_spill] sm:$0xff] %v2175_v36  ;;  %v275_v38 = vld [vmem:[%s3113_s1 + $0x40] sm:$0xff]  ;;  %v2197_v40 = vld [vmem:[%s3114_s2 + $0x88] sm:$0xff] }
  0x33   : > { %521 = vmatpush.msra.mxu3 %v2061_v14  ;;  %1568 = vmatpush.msrb.mxu2 %v274_v25  ;;  %v2192_v39 = vld [vmem:[%s3114_s2 + $0x18] sm:$0xff]  ;;  %v272_v41 = vld [vmem:[%s3113_s1 + $0x28] sm:$0xff]  ;;  %v2207_v42 = vld [vmem:[%s3114_s2] sm:$0xff] }
  0x34   : > { %557 = vmatpush.msrb.mxu0 %v2066_v15  ;;  %366 = vmatpush.msra.mxu1 %v274_v25  ;;  %3143 = vst [vmem:[#allocation9_spill] sm:$0xff] %v2192_v39  ;;  %v2212_v43 = vld [vmem:[%s3114_s2 + $0x70] sm:$0xff]  ;;  %v2217_v44 = vld [vmem:[#allocation2] sm:$0xff]  ;;  %v2220_v45 = vld [vmem:[%s1990_s9 + $0x18] sm:$0xff] }
  0x35   : > { %522 = vmatpush.msra.mxu3 %v2073_v16  ;;  %1569 = vmatpush.msrb.mxu2 %v271_v28  ;;  %3144 = vst [vmem:[#allocation10_spill] sm:$0xff] %v2207_v42  ;;  %v2226_v46 = vld [vmem:[%s3114_s2 + $0x170] sm:$0xff]  ;;  %v2231_v47 = vld [vmem:[%s3114_s2 + $0x58] sm:$0xff]  ;;  %v2250_v50 = vld [vmem:[%s3114_s2 + $0x40] sm:$0xff] }
  0x36   : > { %558 = vmatpush.msrb.mxu0 %v2078_v17  ;;  %367 = vmatpush.msra.mxu1 %v271_v28  ;;  %v269_v48 = vld [vmem:[%s3113_s1 + $0x10] sm:$0xff]  ;;  %v2245_v49 = vld [vmem:[%s3114_s2 + $0x158] sm:$0xff]  ;;  %3145 = vst [vmem:[#allocation11_spill] sm:$0xff] %v2250_v50  ;;  %v2257_v51 = vld [vmem:[%s3114_s2 + $0x140] sm:$0xff] }
  0x37   : > { %1519 = vmatmul.msk.f32.gmra.mxu0 %vm287_vm0, %v2082_v18  ;;  %523 = vmatpush.msra.mxu3 %v2091_v20  ;;  %v2262_v52 = vld [vmem:[%s3114_s2 + $0x28] sm:$0xff]  ;;  %v2277_v54 = vld [vmem:[%s3114_s2 + $0x10] sm:$0xff]  ;;  %v2282_v55 = vld [vmem:[%s1990_s9 + $0x20] sm:$0xff] }
  0x38   : > { %559 = vmatpush.msrb.mxu0 %v2096_v21  ;;  %1570 = vmatpush.msrb.mxu2 %v268_v32  ;;  %3146 = vst [vmem:[#allocation12_spill] sm:$0xff] %v2262_v52  ;;  %v2270_v53 = vld [vmem:[%s3114_s2 + $0x128] sm:$0xff]  ;;  %v2288_v56 = vld [vmem:[%s3114_s2 + $0x110] sm:$0xff]  ;;  %v2300_v57 = vld [vmem:[%s3114_s2 + $0xf8] sm:$0xff] }
  0x39   : > { %524 = vmatpush.msra.mxu3 %v2110_v23  ;;  %1533 = vmatmul.msk.f32.vlgmr.msrb.gmra.mxu2 %vm287_vm0, %v2086_v19  ;;  %3147 = vst [vmem:[#allocation13_spill] sm:$0xff] %v2277_v54  ;;  %v2308_v58 = vld [vmem:[%s3114_s2 + $0xe0] sm:$0xff]  ;;  %v2317_v59 = vld [vmem:[%s3114_s2 + $0xc8] sm:$0xff]  ;;  %v2330_v61 = vld [vmem:[%s3114_s2 + $0xb0] sm:$0xff] }
  0x3a   : > { %560 = vmatpush.msrb.mxu0 %v2115_v24  ;;  %406 = vmatpush.msra.mxu2 %v278_v35  ;;  %v2324_v60 = vld [vmem:[%s1990_s9 + $0x28] sm:$0xff]  ;;  %v2342_v62 = vld [vmem:[%s3114_s2 + $0x98] sm:$0xff]  ;;  %v2350_v63 = vld [vmem:[%s3114_s2 + $0x80] sm:$0xff] }
  0x3b   : > { %525 = vmatpush.msra.mxu3 %v2125_v26  ;;  %368 = vmatpush.msra.mxu1 %v268_v32  ;;  %v2359_v0 = vld [vmem:[%s3114_s2 + $0x68] sm:$0xff]  ;;  %v2366_v2 = vld [vmem:[%s1990_s9 + $0x30] sm:$0xff]  ;;  %v2384_v6 = vld [vmem:[%s3114_s2 + $0x38] sm:$0xff]  ;;  %s1572_s9 = smul.u32 24, %s1859_s22 }
  0x3c   : > { %561 = vmatpush.msrb.mxu0 %v2130_v27  ;;  %407 = vmatpush.msra.mxu2 %v275_v38  ;;  %v2372_v4 = vld [vmem:[%s3114_s2 + $0x50] sm:$0xff]  ;;  %3148 = vst [vmem:[#allocation14_spill] sm:$0xff] %v2384_v6  ;;  %v2392_v8 = vld [vmem:[%s3114_s2 + $0x20] sm:$0xff] }
  0x3d   : > { %526 = vmatpush.msra.mxu3 %v2140_v29  ;;  %1526 = vmatmul.msk.f32.vlgmr.msra.gmra.mxu1 %vm287_vm0, %v2031_v9  ;;  %3149 = vst [vmem:[#allocation15_spill] sm:$0xff] %v2392_v8  ;;  %s1421_s17 = sadd.s32 %s1572_s9, %s1979_s13  ;;  %s1797_s9 = scalar_lea.hbm %s3117_s5, 384 }
  0x3e   : > { %562 = vmatpush.msrb.mxu0 %v2145_v30  ;;  %408 = vmatpush.msra.mxu2 %v272_v41  ;;  %s1560_s22 = sshll.u32 %s1421_s17, 3 }
  0x3f   : > { %1520 = vmatmul.msk.f32.gmra.mxu0 %vm287_vm0, %v2149_v31  ;;  %527 = vmatpush.msra.mxu3 %v2158_v33  ;;  %s1423_s14 = scalar_lea.hbm %s3117_s5, %s1560_s22 }
  0x40   : > { %563 = vmatpush.msrb.mxu0 %v2163_v34  ;;  %627 = vmatpush.msrb.mxu1 %v1998_v1  ;;  %s1426_s13 = sshll.u32 %s1423_s14, 4  ;;  %s1427_s13 = int_to_ptr.hbm [resolvable:$true] %s1426_s13 }
  0x41   : > { %528 = vmatpush.msra.mxu3 %v2175_v36  ;;  %409 = vmatpush.msra.mxu2 %v269_v48  ;;  %s1791_s30 = sshra.s32 %s1427_s13, 4  ;;  %s1792_s30 = int_to_ptr.hbm [resolvable:$true] %s1791_s30 }
  0x42   : > { %564 = vmatpush.msrb.mxu0 %v2180_v37  ;;  %628 = vmatpush.msrb.mxu1 %v2006_v3  ;;  %s1793_s8 = scalar_lea.hbm %s1792_s30, 64  ;;  %p1798_p5 = scmp.lt.s32.totalorder %s1792_s30, %s3117_s5 }
  0x43   : > { %529 = vmatpush.msra.mxu3 %v2192_v39  ;;  %1534 = vmatmul.msk.f32.vlgmr.msra.gmra.mxu2 %vm287_vm0, %v2031_v9  ;;  %v2401_v9 = vld [vmem:[%s3114_s2 + $0x8] sm:$0xff]  ;;  %p1794_p1 = scmp.ne.s32.totalorder %s1792_s30, %s1793_s8  ;;  %p1799_p6 = scmp.lt.s32.totalorder %s1797_s9, %s1793_s8 }
  0x44   : > { %565 = vmatpush.msrb.mxu0 %v2197_v40  ;;  %629 = vmatpush.msrb.mxu1 %v2015_v5  ;;  %3150 = vst [vmem:[#allocation16_spill] sm:$0xff] %v2401_v9 }
  0x45   : > { %530 = vmatpush.msra.mxu3 %v2207_v42  ;;  %647 = vmatpush.msrb.mxu2 %v2226_v46  ;;  %p1795_p2 = pnand %p1794_p1, %p1957_p3  ;;  %p1800_p7 = por %p1799_p6, %p1798_p5 }
  0x46   : > { %566 = vmatpush.msrb.mxu0 %v2212_v43  ;;  %531 = vmatmul.f32.vlgmr.msra.gmra.mxu3 %v2217_v44 }
  0x47   : > { %1521 = vmatmul.msk.f32.gmra.mxu0 %vm287_vm0, %v2220_v45  ;;  %535 = vmatpush.msrb.mxu3 %v2226_v46  ;;  %p1796_p4 = pneg %p1795_p2 }
  0x48   : > { %567 = vmatpush.msrb.mxu0 %v2231_v47  ;;  %1527 = vmatmul.msk.f32.gmra.mxu1 %vm287_vm0, %v2082_v18 }
  0x49   : > { %536 = vmatpush.msrb.mxu3 %v2245_v49  ;;  %648 = vmatpush.msrb.mxu2 %v2245_v49  ;;  %p1801_p9 = pnand %p1800_p7, %p1796_p4 }
  0x4a   : > { %568 = vmatpush.msrb.mxu0 %v2250_v50  ;;  %630 = vmatpush.msrb.mxu1 %v2024_v7 }
  0x4b   : > { %537 = vmatpush.msrb.mxu3 %v2257_v51  ;;  %649 = vmatpush.msrb.mxu2 %v2257_v51 }
  0x4c   : > { %569 = vmatpush.msrb.mxu0 %v2262_v52  ;;  %631 = vmatpush.msrb.mxu1 %v2036_v10 }
  0x4d   : > { %538 = vmatpush.msrb.mxu3 %v2270_v53  ;;  %1535 = vmatmul.msk.f32.gmra.mxu2 %vm287_vm0, %v2082_v18 }
  0x4e   : > { %570 = vmatpush.msrb.mxu0 %v2277_v54  ;;  %650 = vmatpush.msrb.mxu2 %v2270_v53 }
  0x4f   : > { %1522 = vmatmul.msk.f32.gmra.mxu0 %vm287_vm0, %v2282_v55  ;;  %539 = vmatpush.msrb.mxu3 %v2288_v56 }
  0x50   : > { %739 = vmatpush.msra.mxu0 %v1998_v1  ;;  %1528 = vmatmul.msk.f32.gmra.mxu1 %vm287_vm0, %v2149_v31 }
  0x51   : > { %540 = vmatpush.msrb.mxu3 %v2300_v57  ;;  %651 = vmatpush.msrb.mxu2 %v2288_v56 }
  0x52   : > { %740 = vmatpush.msra.mxu0 %v2006_v3  ;;  %632 = vmatpush.msrb.mxu1 %v2044_v11 }
  0x53   : > { %541 = vmatpush.msrb.mxu3 %v2308_v58  ;;  %652 = vmatpush.msrb.mxu2 %v2300_v57 }
  0x54   : > { %741 = vmatpush.msra.mxu0 %v2015_v5  ;;  %633 = vmatpush.msrb.mxu1 %v2061_v14 }
  0x55   : > { %542 = vmatpush.msrb.mxu3 %v2317_v59  ;;  %653 = vmatpush.msrb.mxu2 %v2308_v58 }
  0x56   : > { %742 = vmatpush.msra.mxu0 %v2024_v7  ;;  %1536 = vmatmul.msk.f32.gmra.mxu2 %vm287_vm0, %v2149_v31 }
  0x57   : > { %1523 = vmatmul.msk.f32.gmra.mxu0 %vm287_vm0, %v2324_v60  ;;  %543 = vmatpush.msrb.mxu3 %v2330_v61 }
  0x58   : > { %634 = vmatpush.msrb.mxu1 %v2073_v16  ;;  %654 = vmatpush.msrb.mxu2 %v2317_v59 }
  0x59   : > { %544 = vmatpush.msrb.mxu3 %v2342_v62  ;;  %1529 = vmatmul.msk.f32.gmra.mxu1 %vm287_vm0, %v2220_v45 }
  0x5a   : > { %743 = vmatpush.msra.mxu0 %v2036_v10  ;;  %655 = vmatpush.msrb.mxu2 %v2330_v61 }
  0x5b   : > { %545 = vmatpush.msrb.mxu3 %v2350_v63  ;;  %635 = vmatpush.msrb.mxu1 %v2091_v20 }
  0x5c   : > { %656 = vmatpush.msrb.mxu2 %v2342_v62  ;;  %744 = vmatpush.msra.mxu0 %v2044_v11 }
  0x5d   : > { %546 = vmatpush.msrb.mxu3 %v2359_v0  ;;  %636 = vmatpush.msrb.mxu1 %v2110_v23 }
  0x5e   : > { %657 = vmatpush.msrb.mxu2 %v2350_v63  ;;  %745 = vmatpush.msra.mxu0 %v2061_v14 }
  0x5f   : > { %1524 = vmatmul.msk.f32.gmra.mxu0 %vm287_vm0, %v2366_v2  ;;  %547 = vmatpush.msrb.mxu3 %v2372_v4 }
  0x60   : > { %1537 = vmatmul.msk.f32.gmra.mxu2 %vm287_vm0, %v2220_v45  ;;  %637 = vmatpush.msrb.mxu1 %v2125_v26 }
  0x61   : > { %548 = vmatpush.msrb.mxu3 %v2384_v6  ;;  %658 = vmatpush.msrb.mxu2 %v2359_v0 }
  0x62   : > { %1530 = vmatmul.msk.f32.gmra.mxu1 %vm287_vm0, %v2282_v55  ;;  %746 = vmatpush.msra.mxu0 %v2073_v16 }
  0x63   : > { %549 = vmatpush.msrb.mxu3 %v2392_v8  ;;  %638 = vmatpush.msrb.mxu1 %v2140_v29 }
  0x64   : > { %659 = vmatpush.msrb.mxu2 %v2372_v4  ;;  %747 = vmatpush.msra.mxu0 %v2091_v20 }
  0x65   : > { %550 = vmatpush.msrb.mxu3 %v2401_v9  ;;  %639 = vmatpush.msrb.mxu1 %v2158_v33 }
  0x66   : > { %551 = vmatmul.f32.vlgmr.msrb.gmra.mxu3 %v2217_v44  ;;  %660 = vmatpush.msrb.mxu2 %v2384_v6 }
  0x67   : > { %571 = vmatmul.f32.vlgmr.msrb.gmra.mxu0 %v2217_v44  ;;  %667 = vmatpush.msra.mxu3 %v2049_v12 }
  0x68   : > { %640 = vmatpush.msrb.mxu1 %v2175_v36  ;;  %1538 = vmatmul.msk.f32.gmra.mxu2 %vm287_vm0, %v2282_v55 }
  0x69   : > { %668 = vmatpush.msra.mxu3 %v2056_v13  ;;  %748 = vmatpush.msra.mxu0 %v2110_v23 }
  0x6a   : > { %1531 = vmatmul.msk.f32.gmra.mxu1 %vm287_vm0, %v2324_v60  ;;  %661 = vmatpush.msrb.mxu2 %v2392_v8 }
  0x6b   : > { %669 = vmatpush.msra.mxu3 %v2066_v15  ;;  %641 = vmatpush.msrb.mxu1 %v2192_v39 }
  0x6c   : > { %749 = vmatpush.msra.mxu0 %v2125_v26  ;;  %662 = vmatpush.msrb.mxu2 %v2401_v9 }
  0x6d   : > { %670 = vmatpush.msra.mxu3 %v2078_v17  ;;  %642 = vmatpush.msrb.mxu1 %v2207_v42 }
  0x6e   : > { %779 = vmatpush.msra.mxu2 %v2049_v12  ;;  %750 = vmatpush.msra.mxu0 %v2140_v29 }
  0x6f   : > { %671 = vmatpush.msra.mxu3 %v2096_v21  ;;  %759 = vmatpush.msra.mxu1 %v2226_v46 }
  0x70   : > { %1539 = vmatmul.msk.f32.gmra.mxu2 %vm287_vm0, %v2324_v60  ;;  %751 = vmatpush.msra.mxu0 %v2158_v33 }
  0x71   : > { %672 = vmatpush.msra.mxu3 %v2115_v24  ;;  %760 = vmatpush.msra.mxu1 %v2245_v49 }
  0x72   : > { %780 = vmatpush.msra.mxu2 %v2056_v13  ;;  %1532 = vmatmul.msk.f32.gmra.mxu1 %vm287_vm0, %v2366_v2 }
  0x73   : > { %673 = vmatpush.msra.mxu3 %v2130_v27  ;;  %761 = vmatpush.msra.mxu1 %v2257_v51 }
  0x74   : > { %781 = vmatpush.msra.mxu2 %v2066_v15  ;;  %752 = vmatpush.msra.mxu0 %v2175_v36 }
  0x75   : > { %674 = vmatpush.msra.mxu3 %v2145_v30  ;;  %762 = vmatpush.msra.mxu1 %v2270_v53 }
  0x76   : > { %782 = vmatpush.msra.mxu2 %v2078_v17  ;;  %753 = vmatpush.msra.mxu0 %v2192_v39 }
  0x77   : > { %675 = vmatpush.msra.mxu3 %v2163_v34  ;;  %763 = vmatpush.msra.mxu1 %v2288_v56 }
  0x78   : > { %1540 = vmatmul.msk.f32.gmra.mxu2 %vm287_vm0, %v2366_v2  ;;  %754 = vmatpush.msra.mxu0 %v2207_v42 }
  0x79   : > { %676 = vmatpush.msra.mxu3 %v2180_v37  ;;  %783 = vmatpush.msra.mxu2 %v2096_v21 }
  0x7a   : > { %764 = vmatpush.msra.mxu1 %v2300_v57  ;;  %871 = vmatpush.msrb.mxu0 %v2226_v46 }
  0x7b   : > { %677 = vmatpush.msra.mxu3 %v2197_v40  ;;  %784 = vmatpush.msra.mxu2 %v2115_v24 }
  0x7c   : > { %765 = vmatpush.msra.mxu1 %v2308_v58  ;;  %872 = vmatpush.msrb.mxu0 %v2245_v49 }
  0x7d   : > { %678 = vmatpush.msra.mxu3 %v2212_v43  ;;  %785 = vmatpush.msra.mxu2 %v2130_v27 }
  0x7e   : > { %766 = vmatpush.msra.mxu1 %v2317_v59  ;;  %873 = vmatpush.msrb.mxu0 %v2257_v51 }
  0x7f   : > { %679 = vmatpush.msra.mxu3 %v2231_v47  ;;  %786 = vmatpush.msra.mxu2 %v2145_v30 }
  0x80   : > { %1541 = vmatmul.msk.f32.gmra.mxu2 %vm287_vm0, %v2086_v19  ;;  %767 = vmatpush.msra.mxu1 %v2330_v61  ;;  %v279_v19 = vld [vmem:[%s3115_s3] sm:$0x7] }
  0x81   : > { %680 = vmatpush.msra.mxu3 %v2250_v50  ;;  %787 = vmatpush.msra.mxu2 %v2163_v34  ;;  %v281_v22 = vperm.slane %v279_v19, 0 }
  0x82   : > { %768 = vmatpush.msra.mxu1 %v2342_v62  ;;  %874 = vmatpush.msrb.mxu0 %v2270_v53 }
  0x83   : > { %681 = vmatpush.msra.mxu3 %v2262_v52  ;;  %788 = vmatpush.msra.mxu2 %v2180_v37 }
  0x84   : > { %769 = vmatpush.msra.mxu1 %v2350_v63  ;;  %875 = vmatpush.msrb.mxu0 %v2288_v56 }
  0x85   : > { %682 = vmatpush.msra.mxu3 %v2277_v54  ;;  %789 = vmatpush.msra.mxu2 %v2197_v40 }
  0x86   : > { %770 = vmatpush.msra.mxu1 %v2359_v0  ;;  %876 = vmatpush.msrb.mxu0 %v2300_v57 }
  0x87   : > { %851 = vmatpush.msrb.mxu3 %v1998_v1  ;;  %790 = vmatpush.msra.mxu2 %v2212_v43 }
  0x88   : > { %771 = vmatpush.msra.mxu1 %v2372_v4  ;;  %877 = vmatpush.msrb.mxu0 %v2308_v58 }
  0x89   : > { %852 = vmatpush.msrb.mxu3 %v2006_v3  ;;  %791 = vmatpush.msra.mxu2 %v2231_v47 }
  0x8a   : > { %772 = vmatpush.msra.mxu1 %v2384_v6  ;;  %878 = vmatpush.msrb.mxu0 %v2317_v59 }
  0x8b   : > { %853 = vmatpush.msrb.mxu3 %v2015_v5  ;;  %792 = vmatpush.msra.mxu2 %v2250_v50 }
  0x8c   : > { %773 = vmatpush.msra.mxu1 %v2392_v8  ;;  %879 = vmatpush.msrb.mxu0 %v2330_v61 }
  0x8d   : > { %854 = vmatpush.msrb.mxu3 %v2024_v7  ;;  %793 = vmatpush.msra.mxu2 %v2262_v52 }
  0x8e   : > { %774 = vmatpush.msra.mxu1 %v2401_v9  ;;  %880 = vmatpush.msrb.mxu0 %v2342_v62 }
  0x8f   : > { %855 = vmatpush.msrb.mxu3 %v2036_v10  ;;  %794 = vmatpush.msra.mxu2 %v2277_v54 }
  0x90   : > { %881 = vmatpush.msrb.mxu0 %v2350_v63 }
  0x91   : > { %856 = vmatpush.msrb.mxu3 %v2044_v11 }
  0x92   : > { %882 = vmatpush.msrb.mxu0 %v2359_v0 }
  0x93   : > { %857 = vmatpush.msrb.mxu3 %v2061_v14 }
  0x94   : > { %883 = vmatpush.msrb.mxu0 %v2372_v4 }
  0x95   : > { %858 = vmatpush.msrb.mxu3 %v2073_v16 }
  0x96   : > { %884 = vmatpush.msrb.mxu0 %v2384_v6 }
  0x97   : > { %859 = vmatpush.msrb.mxu3 %v2091_v20 }
  0x98   : > { %885 = vmatpush.msrb.mxu0 %v2392_v8 }
  0x99   : > { %860 = vmatpush.msrb.mxu3 %v2110_v23 }
  0x9a   : > { %886 = vmatpush.msrb.mxu0 %v2401_v9 }
  0x9b   : > { %861 = vmatpush.msrb.mxu3 %v2125_v26 }
  0x9d   : > { %862 = vmatpush.msrb.mxu3 %v2140_v29 }
  0x9f   : > { %863 = vmatpush.msrb.mxu3 %v2158_v33 }
  0xa1   : > { %864 = vmatpush.msrb.mxu3 %v2175_v36 }
  0xa3   : > { %865 = vmatpush.msrb.mxu3 %v2192_v39 }
  0xa5   : > { %866 = vmatpush.msrb.mxu3 %v2207_v42 }
  0xac   : > { %v329_v18 = vpop.f32.mrf.mxu0 }
  0xad   : > { %v330_v48 = vadd.f32 %v329_v18, %v281_v22 }
  0xb3   : > { %v350_v31 = vpop.f32.mrf.mxu2 }
  0xb4   : > { %v332_v25 = vpop.f32.mrf.mxu0  ;;  %v2529_v32 = vadd.f32 %v350_v31, %v281_v22 }
  0xb5   : > { %v2527_v28 = vadd.f32 %v332_v25, %v281_v22 }
  0xb6   : > { %3152 = vst [vmem:[#allocation18_spill] sm:$0xff] %v2529_v32 }
  0xb7   : > { %3151 = vst [vmem:[#allocation17_spill] sm:$0xff] %v2527_v28 }
  0xba   : > { %v370_v18 = vpop.f32.mrf.mxu1 }
  0xbc   : > { %v335_v35 = vpop.f32.mrf.mxu0 }
  0xbd   : > { %v2531_v38 = vadd.f32 %v335_v35, %v281_v22 }
  0xbf   : > { %3153 = vst [vmem:[#allocation19_spill] sm:$0xff] %v2531_v38 }
  0xc4   : > { %v338_v41 = vpop.f32.mrf.mxu0 }
  0xc5   : > { %v2533_v45 = vadd.f32 %v338_v41, %v281_v22  ;;  %v2541_v41 = vperm.slane %v279_v19, 1 }
  0xc7   : > { %3154 = vst [vmem:[#allocation20_spill] sm:$0xff] %v2533_v45 }
  0xc8   : > { %3158 = vst [vmem:[#allocation24_spill] sm:$0xff] %v2541_v41 }
  0xc9   : > { %v532_v55 = vpop.f32.mrf.mxu3 }
  0xca   : > { %v575_v60 = vadd.f32 %v532_v55, %v330_v48  ;;  %v371_v48 = vadd.f32 %v370_v18, %v2541_v41 }
  0xcc   : > { %v341_v2 = vpop.f32.mrf.mxu0  ;;  %v1542_v9 = vmul.f32 -1.442695, %v575_v60 }
  0xcd   : > { %v2535_v42 = vadd.f32 %v341_v2, %v281_v22 }
  0xce   : > { %1648 = vpow2.f32 %v1542_v9 }
  0xcf   : > { %3155 = vst [vmem:[#allocation21_spill] sm:$0xff] %v2535_v42 }
  0xd4   : > { %v344_v54 = vpop.f32.mrf.mxu0  ;;  %v1649_v28 = vpop.eup %1648 }
  0xd5   : > { %v2537_v25 = vadd.f32 %v344_v54, %v281_v22  ;;  %v579_v31 = vadd.f32 1.0, %v1649_v28  ;;  %v2544_v54 = vpop.f32.mrf.mxu2 }
  0xd6   : > { %3159 = vst [vmem:[#allocation25_spill] sm:$0xff] %v2544_v54 }
  0xd7   : > { %3156 = vst [vmem:[#allocation22_spill] sm:$0xff] %v2537_v25  ;;  %1650 = vrcp.f32 %v579_v31  ;;  %v591_v25 = vand.u32 2147483648, %v579_v31  ;;  %vm585_vm2 = vweird.f32 %v579_v31 }
  0xdc   : > { %v347_v32 = vpop.f32.mrf.mxu0 }
  0xdd   : > { %v2539_v35 = vadd.f32 %v347_v32, %v281_v22  ;;  %v1651_v38 = vpop.eup %1650  ;;  %v2549_v22 = vld [vmem:[%s3116_s4] ss:$0 sm:$0xff]  ;;  %v589_v32 = vand.u32 2147483647, %v579_v31 }
  0xde   : > { %v581_v45 = vmul.f32 %v1651_v38, %v579_v31  ;;  %vm586_vm1 = vweird.f32 %v1651_v38 }
  0xdf   : > { %3157 = vst [vmem:[#allocation23_spill] sm:$0xff] %v2539_v35  ;;  %vm587_vm3 = vmor %vm585_vm2, %vm586_vm1  ;;  %vm590_vm4 = vcmp.eq.f32.partialorder %v589_v32, 8.507059e+37 }
  0xe0   : > { %v582_v55 = vsub.f32 1.0, %v581_v45 }
  0xe2   : > { %v583_v42 = vmul.f32 %v1651_v38, %v582_v55 }
  0xe4   : > { %v584_v28 = vadd.f32 %v1651_v38, %v583_v42  ;;  %v572_v18 = vpop.f32.mrf.mxu0 }
  0xe5   : > { %v615_v55 = vadd.f32 %v2549_v22, %v572_v18 }
  0xe6   : > { %v588_v45 = vsel %vm587_vm3, %v1651_v38, %v584_v28 }
  0xe9   : > { %v552_v60 = vpop.f32.mrf.mxu3 }
  0xea   : > { %v595_v2 = vadd.f32 %v552_v60, %v371_v48  ;;  %v592_v60 = vor.u32 1.1754944e-38, %v591_v25 }
  0xec   : > { %v1543_v9 = vmul.f32 -1.442695, %v595_v2  ;;  %v2552_v2 = vperm.slane %v279_v19, 2  ;;  %v593_v42 = vsel %vm590_vm4, %v592_v60, %v588_v45 }
  0xed   : > { %v616_v54 = vmul.f32 %v615_v55, %v593_v42  ;;  %v373_v42 = vpop.f32.mrf.mxu1 }
  0xee   : > { %1652 = vpow2.f32 %v1543_v9  ;;  %v411_v9 = vpop.f32.mrf.mxu2 }
  0xef   : > { %v412_v41 = vadd.f32 %v411_v9, %v2552_v2 }
  0xf1   : > { %v617_v31 = vadd.f32 %v616_v54, %v412_v41  ;;  %v3166_v54 = vld [vmem:[#allocation10_spill] sm:$0xff] }
  0xf4   : > { %v1653_v35 = vpop.eup %1652 }
  0xf5   : > { %v599_v48 = vadd.f32 1.0, %v1653_v35 }
  0xf6   : > { %v414_v55 = vpop.f32.mrf.mxu2 }
  0xf7   : > { %1654 = vrcp.f32 %v599_v48  ;;  %v611_v6 = vand.u32 2147483648, %v599_v48  ;;  %v609_v38 = vand.u32 2147483647, %v599_v48  ;;  %vm605_vm6 = vweird.f32 %v599_v48 }
  0xf8   : > { %1656 = vtanh.f32 %v617_v31  ;;  %v2613_v31 = vpop.f32.mrf.mxu1 }
  0xf9   : > { %v612_v19 = vor.u32 1.1754944e-38, %v611_v6  ;;  %vm610_vm8 = vcmp.eq.f32.partialorder %v609_v38, 8.507059e+37  ;;  %v3164_v6 = vld [vmem:[#allocation15_spill] sm:$0xff]  ;;  %3169 = vst [vmem:[#allocation27_spill] sm:$0xff] %v2613_v31  ;;  %v3179_v31 = vld [vmem:[#allocation17_spill] sm:$0xff] }
  0xfd   : > { %v1655_v8 = vpop.eup %1654 }
  0xfe   : > { %v601_v39 = vmul.f32 %v1655_v8, %v599_v48  ;;  %vm606_vm5 = vweird.f32 %v1655_v8  ;;  %v1657_v18 = vpop.eup %1656  ;;  %v3167_v48 = vld [vmem:[#allocation16_spill] sm:$0xff]  ;;  %v2611_v9 = vpop.f32.mrf.mxu2 }
  0xff   : > { %vm607_vm7 = vmor %vm605_vm6, %vm606_vm5  ;;  %3168 = vst [vmem:[#allocation26_spill] sm:$0xff] %v2611_v9 }
 0x100   : > { %v602_v52 = vsub.f32 1.0, %v601_v39  ;;  %v3161_v39 = vld [vmem:[#allocation14_spill] sm:$0xff] }
 0x102   : > { %v603_v36 = vmul.f32 %v1655_v8, %v602_v52  ;;  %v3163_v52 = vld [vmem:[#allocation9_spill] sm:$0xff] }
 0x104   : > { %v604_v25 = vadd.f32 %v1655_v8, %v603_v36  ;;  %v3160_v36 = vld [vmem:[#allocation8_spill] sm:$0xff] }
 0x106   : > { %v608_v35 = vsel %vm607_vm7, %v1655_v8, %v604_v25  ;;  %v3165_v8 = vld [vmem:[#allocation13_spill] sm:$0xff]  ;;  %v2615_v38 = vpop.f32.mrf.mxu2  ;;  %v2617_v25 = vpop.f32.mrf.mxu1 }
 0x107   : > { %v613_v28 = vsel %vm610_vm8, %v612_v19, %v608_v35  ;;  %3170 = vst [vmem:[#allocation28_spill] sm:$0xff] %v2615_v38 }
 0x108   : > { %v619_v32 = vsub.f32 1.0, %v613_v28  ;;  %v621_v60 = vmul.f32 %v613_v28, %v2217_v44  ;;  %v3162_v44 = vld [vmem:[#allocation12_spill] sm:$0xff]  ;;  %3171 = vst [vmem:[#allocation29_spill] sm:$0xff] %v2617_v25 }
 0x10a   : > { %v620_v45 = vmul.f32 %v1657_v18, %v619_v32 }
 0x10c   : > { %v2556_v41 = vadd.f32 %v621_v60, %v620_v45 }
 0x10e   : > { %623 = vst [vmem:[%s1992_s10] sm:$0xff] %v2556_v41  ;;  %643 = vmatmul.f32.vlgmr.msrb.gmra.mxu1 %v2556_v41  ;;  %663 = vmatmul.f32.vlgmr.msrb.gmra.mxu2 %v2556_v41  ;;  %v2619_v19 = vpop.f32.mrf.mxu2  ;;  %v2621_v35 = vpop.f32.mrf.mxu1 }
 0x10f   : > { %683 = vmatmul.f32.vlgmr.msra.gmra.mxu3 %v2556_v41  ;;  %891 = vmatpush.msrb.mxu1 %v2049_v12  ;;  %3172 = vst [vmem:[#allocation30_spill] sm:$0xff] %v2619_v19 }
 0x110   : > { %963 = vmatpush.msrb.mxu2 %v1998_v1  ;;  %983 = vmatpush.msra.mxu3 %v2226_v46  ;;  %3173 = vst [vmem:[#allocation31_spill] sm:$0xff] %v2621_v35 }
 0x111   : > { %892 = vmatpush.msrb.mxu1 %v2056_v13 }
 0x112   : > { %964 = vmatpush.msrb.mxu2 %v2006_v3  ;;  %984 = vmatpush.msra.mxu3 %v2245_v49 }
 0x113   : > { %893 = vmatpush.msrb.mxu1 %v2066_v15 }
 0x114   : > { %965 = vmatpush.msrb.mxu2 %v2015_v5  ;;  %985 = vmatpush.msra.mxu3 %v2257_v51 }
 0x115   : > { %894 = vmatpush.msrb.mxu1 %v2078_v17 }
 0x116   : > { %966 = vmatpush.msrb.mxu2 %v2024_v7  ;;  %986 = vmatpush.msra.mxu3 %v2270_v53  ;;  %v2623_v28 = vpop.f32.mrf.mxu2  ;;  %v2625_v32 = vpop.f32.mrf.mxu1 }
 0x117   : > { %895 = vmatpush.msrb.mxu1 %v2096_v21  ;;  %3174 = vst [vmem:[#allocation32_spill] sm:$0xff] %v2623_v28 }
 0x118   : > { %967 = vmatpush.msrb.mxu2 %v2036_v10  ;;  %987 = vmatpush.msra.mxu3 %v2288_v56  ;;  %3175 = vst [vmem:[#allocation33_spill] sm:$0xff] %v2625_v32 }
 0x119   : > { %896 = vmatpush.msrb.mxu1 %v2115_v24 }
 0x11a   : > { %968 = vmatpush.msrb.mxu2 %v2044_v11  ;;  %988 = vmatpush.msra.mxu3 %v2300_v57 }
 0x11b   : > { %897 = vmatpush.msrb.mxu1 %v2130_v27 }
 0x11c   : > { %969 = vmatpush.msrb.mxu2 %v2061_v14  ;;  %989 = vmatpush.msra.mxu3 %v2308_v58 }
 0x11d   : > { %898 = vmatpush.msrb.mxu1 %v2145_v30 }
 0x11e   : > { %970 = vmatpush.msrb.mxu2 %v2073_v16  ;;  %990 = vmatpush.msra.mxu3 %v2317_v59  ;;  %v2627_v18 = vpop.f32.mrf.mxu2  ;;  %v2629_v45 = vpop.f32.mrf.mxu1 }
 0x11f   : > { %899 = vmatpush.msrb.mxu1 %v2163_v34  ;;  %3176 = vst [vmem:[#allocation34_spill] sm:$0xff] %v2627_v18 }
 0x120   : > { %971 = vmatpush.msrb.mxu2 %v2091_v20  ;;  %991 = vmatpush.msra.mxu3 %v2330_v61  ;;  %3177 = vst [vmem:[#allocation35_spill] sm:$0xff] %v2629_v45 }
 0x121   : > { %900 = vmatpush.msrb.mxu1 %v2180_v37 }
 0x122   : > { %972 = vmatpush.msrb.mxu2 %v2110_v23  ;;  %992 = vmatpush.msra.mxu3 %v2342_v62 }
 0x123   : > { %901 = vmatpush.msrb.mxu1 %v2197_v40 }
 0x124   : > { %973 = vmatpush.msrb.mxu2 %v2125_v26  ;;  %993 = vmatpush.msra.mxu3 %v2350_v63 }
 0x125   : > { %902 = vmatpush.msrb.mxu1 %v2212_v43 }
 0x126   : > { %974 = vmatpush.msrb.mxu2 %v2140_v29  ;;  %994 = vmatpush.msra.mxu3 %v2359_v0  ;;  %v2631_v60 = vpop.f32.mrf.mxu2 }
 0x127   : > { %903 = vmatpush.msrb.mxu1 %v2231_v47  ;;  %3178 = vst [vmem:[#allocation36_spill] sm:$0xff] %v2631_v60 }
 0x128   : > { %975 = vmatpush.msrb.mxu2 %v2158_v33  ;;  %995 = vmatpush.msra.mxu3 %v2372_v4 }
 0x129   : > { %904 = vmatpush.msrb.mxu1 %v2250_v50 }
 0x12a   : > { %976 = vmatpush.msrb.mxu2 %v3160_v36  ;;  %996 = vmatpush.msra.mxu3 %v3161_v39 }
 0x12b   : > { %905 = vmatpush.msrb.mxu1 %v3162_v44 }
 0x12c   : > { %977 = vmatpush.msrb.mxu2 %v3163_v52  ;;  %997 = vmatpush.msra.mxu3 %v3164_v6 }
 0x12d   : > { %906 = vmatpush.msrb.mxu1 %v3165_v8 }
 0x12e   : > { %978 = vmatpush.msrb.mxu2 %v3166_v54  ;;  %998 = vmatpush.msra.mxu3 %v3167_v48  ;;  %v3180_v54 = vld [vmem:[#allocation24_spill] sm:$0xff] }
 0x12f   : > { %v374_v25 = vadd.f32 %v373_v42, %v3180_v54 }
 0x18b   : > { %v644_v9 = vpop.f32.mrf.mxu1 }
 0x18c   : > { %v687_v48 = vadd.f32 %v644_v9, %v3179_v31 }
 0x18e   : > { %v1544_v38 = vmul.f32 -1.442695, %v687_v48 }
 0x190   : > { %1658 = vpow2.f32 %v1544_v38 }
 0x191   : > { %v664_v19 = vpop.f32.mrf.mxu2 }
 0x192   : > { %v707_v8 = vadd.f32 %v664_v19, %v374_v25  ;;  %v684_v42 = vpop.f32.mrf.mxu3 }
 0x193   : > { %v727_v19 = vadd.f32 %v2549_v22, %v684_v42 }
 0x194   : > { %v1545_v35 = vmul.f32 -1.442695, %v707_v8 }
 0x196   : > { %v1659_v6 = vpop.eup %1658  ;;  %1660 = vpow2.f32 %v1545_v35  ;;  %v415_v35 = vadd.f32 %v414_v55, %v2552_v2 }
 0x197   : > { %v691_v28 = vadd.f32 1.0, %v1659_v6 }
 0x199   : > { %1662 = vrcp.f32 %v691_v28  ;;  %v703_v44 = vand.u32 2147483648, %v691_v28  ;;  %v701_v48 = vand.u32 2147483647, %v691_v28  ;;  %vm697_vm10 = vweird.f32 %v691_v28 }
 0x19b   : > { %v704_v8 = vor.u32 1.1754944e-38, %v703_v44  ;;  %vm702_vm12 = vcmp.eq.f32.partialorder %v701_v48, 8.507059e+37 }
 0x19c   : > { %v1661_v32 = vpop.eup %1660 }
 0x19d   : > { %v711_v18 = vadd.f32 1.0, %v1661_v32 }
 0x19f   : > { %v1663_v52 = vpop.eup %1662  ;;  %1664 = vrcp.f32 %v711_v18  ;;  %v721_v36 = vand.u32 2147483647, %v711_v18  ;;  %vm717_vm14 = vweird.f32 %v711_v18 }
 0x1a0   : > { %v693_v45 = vmul.f32 %v1663_v52, %v691_v28  ;;  %vm698_vm9 = vweird.f32 %v1663_v52 }
 0x1a1   : > { %vm699_vm11 = vmor %vm697_vm10, %vm698_vm9  ;;  %vm722_vm0 = vcmp.eq.f32.partialorder %v721_v36, 8.507059e+37 }
 0x1a2   : > { %v694_v60 = vsub.f32 1.0, %v693_v45 }
 0x1a4   : > { %v695_v39 = vmul.f32 %v1663_v52, %v694_v60  ;;  %v723_v60 = vand.u32 2147483648, %v711_v18 }
 0x1a5   : > { %v1665_v9 = vpop.eup %1664 }
 0x1a6   : > { %v713_v31 = vmul.f32 %v1665_v9, %v711_v18  ;;  %v696_v38 = vadd.f32 %v1663_v52, %v695_v39  ;;  %vm718_vm13 = vweird.f32 %v1665_v9  ;;  %v724_v28 = vor.u32 1.1754944e-38, %v723_v60 }
 0x1a7   : > { %vm719_vm15 = vmor %vm717_vm14, %vm718_vm13 }
 0x1a8   : > { %v714_v25 = vsub.f32 1.0, %v713_v31  ;;  %v700_v6 = vsel %vm699_vm11, %v1663_v52, %v696_v38 }
 0x1a9   : > { %v705_v32 = vsel %vm702_vm12, %v704_v8, %v700_v6 }
 0x1aa   : > { %v715_v45 = vmul.f32 %v1665_v9, %v714_v25  ;;  %v728_v54 = vmul.f32 %v727_v19, %v705_v32 }
 0x1ac   : > { %v716_v50 = vadd.f32 %v1665_v9, %v715_v45  ;;  %v729_v39 = vadd.f32 %v728_v54, %v415_v35 }
 0x1ae   : > { %v720_v44 = vsel %vm719_vm15, %v1665_v9, %v716_v50  ;;  %1666 = vtanh.f32 %v729_v39  ;;  %v3193_v39 = vld [vmem:[#allocation26_spill] sm:$0xff] }
 0x1af   : > { %v725_v52 = vsel %vm722_vm0, %v724_v28, %v720_v44  ;;  %v418_v28 = vadd.f32 %v3193_v39, %v2552_v2 }
 0x1b0   : > { %v731_v48 = vsub.f32 1.0, %v725_v52  ;;  %v733_v55 = vmul.f32 %v725_v52, %v2556_v41 }
 0x1b4   : > { %v1667_v42 = vpop.eup %1666 }
 0x1b5   : > { %v732_v31 = vmul.f32 %v1667_v42, %v731_v48 }
 0x1b7   : > { %v2638_v38 = vadd.f32 %v733_v55, %v732_v31 }
 0x1b9   : > { %735 = vst [vmem:[%s1992_s10 + $0x8] sm:$0xff] %v2638_v38  ;;  %755 = vmatmul.f32.vlgmr.msra.gmra.mxu0 %v2638_v38  ;;  %775 = vmatmul.f32.vlgmr.msra.gmra.mxu1 %v2638_v38 }
 0x1ba   : > { %795 = vmatmul.f32.vlgmr.msra.gmra.mxu2 %v2638_v38  ;;  %1003 = vmatpush.msra.mxu0 %v2049_v12  ;;  %v3187_v12 = vld [vmem:[#allocation13_spill] sm:$0xff] }
 0x1bb   : > { %1075 = vmatpush.msra.mxu1 %v1998_v1  ;;  %1095 = vmatpush.msra.mxu2 %v2226_v46  ;;  %v3181_v1 = vld [vmem:[#allocation11_spill] sm:$0xff] }
 0x1bc   : > { %1004 = vmatpush.msra.mxu0 %v2056_v13  ;;  %v3188_v13 = vld [vmem:[#allocation10_spill] sm:$0xff] }
 0x1bd   : > { %1076 = vmatpush.msra.mxu1 %v2006_v3  ;;  %1096 = vmatpush.msra.mxu2 %v2245_v49  ;;  %v3182_v3 = vld [vmem:[#allocation8_spill] sm:$0xff] }
 0x1be   : > { %1005 = vmatpush.msra.mxu0 %v2066_v15  ;;  %v3190_v15 = vld [vmem:[#allocation24_spill] sm:$0xff] }
 0x1bf   : > { %1077 = vmatpush.msra.mxu1 %v2015_v5  ;;  %1097 = vmatpush.msra.mxu2 %v2257_v51  ;;  %v3183_v5 = vld [vmem:[#allocation14_spill] sm:$0xff] }
 0x1c0   : > { %1006 = vmatpush.msra.mxu0 %v2078_v17 }
 0x1c1   : > { %1078 = vmatpush.msra.mxu1 %v2024_v7  ;;  %1098 = vmatpush.msra.mxu2 %v2270_v53  ;;  %v3184_v7 = vld [vmem:[#allocation12_spill] sm:$0xff] }
 0x1c2   : > { %1007 = vmatpush.msra.mxu0 %v2096_v21 }
 0x1c3   : > { %1079 = vmatpush.msra.mxu1 %v2036_v10  ;;  %1099 = vmatpush.msra.mxu2 %v2288_v56  ;;  %v3185_v10 = vld [vmem:[#allocation9_spill] sm:$0xff] }
 0x1c4   : > { %1008 = vmatpush.msra.mxu0 %v2115_v24 }
 0x1c5   : > { %1080 = vmatpush.msra.mxu1 %v2044_v11  ;;  %1100 = vmatpush.msra.mxu2 %v2300_v57  ;;  %v3186_v11 = vld [vmem:[#allocation15_spill] sm:$0xff] }
 0x1c6   : > { %1009 = vmatpush.msra.mxu0 %v2130_v27 }
 0x1c7   : > { %1081 = vmatpush.msra.mxu1 %v2061_v14  ;;  %1101 = vmatpush.msra.mxu2 %v2308_v58  ;;  %v3189_v14 = vld [vmem:[#allocation16_spill] sm:$0xff] }
 0x1c8   : > { %1010 = vmatpush.msra.mxu0 %v2145_v30 }
 0x1c9   : > { %1082 = vmatpush.msra.mxu1 %v2073_v16  ;;  %1102 = vmatpush.msra.mxu2 %v2317_v59  ;;  %v3191_v16 = vld [vmem:[#allocation27_spill] sm:$0xff] }
 0x1ca   : > { %1011 = vmatpush.msra.mxu0 %v2163_v34  ;;  %v377_v17 = vadd.f32 %v3191_v16, %v3190_v15  ;;  %v2710_v16 = vld [vmem:[%s3114_s2 + $0x178] sm:$0xff] }
 0x1cb   : > { %1083 = vmatpush.msra.mxu1 %v2091_v20  ;;  %1103 = vmatpush.msra.mxu2 %v2330_v61 }
 0x1cc   : > { %1012 = vmatpush.msra.mxu0 %v2180_v37 }
 0x1cd   : > { %1084 = vmatpush.msra.mxu1 %v2110_v23  ;;  %1104 = vmatpush.msra.mxu2 %v2342_v62  ;;  %v3192_v23 = vld [vmem:[#allocation19_spill] sm:$0xff] }
 0x1ce   : > { %1013 = vmatpush.msra.mxu0 %v2197_v40 }
 0x1cf   : > { %1085 = vmatpush.msra.mxu1 %v2125_v26  ;;  %1105 = vmatpush.msra.mxu2 %v2350_v63 }
 0x1d0   : > { %1014 = vmatpush.msra.mxu0 %v2212_v43 }
 0x1d1   : > { %1086 = vmatpush.msra.mxu1 %v2140_v29  ;;  %1106 = vmatpush.msra.mxu2 %v2359_v0 }
 0x1d2   : > { %1015 = vmatpush.msra.mxu0 %v2231_v47 }
 0x1d3   : > { %1087 = vmatpush.msra.mxu1 %v2158_v33  ;;  %1107 = vmatpush.msra.mxu2 %v2372_v4 }
 0x1d4   : > { %1016 = vmatpush.msra.mxu0 %v3181_v1 }
 0x1d5   : > { %1088 = vmatpush.msra.mxu1 %v3182_v3  ;;  %1108 = vmatpush.msra.mxu2 %v3183_v5 }
 0x1d6   : > { %1017 = vmatpush.msra.mxu0 %v3184_v7 }
 0x1d7   : > { %1089 = vmatpush.msra.mxu1 %v3185_v10  ;;  %1109 = vmatpush.msra.mxu2 %v3186_v11 }
 0x1d8   : > { %1018 = vmatpush.msra.mxu0 %v3187_v12 }
 0x1d9   : > { %1090 = vmatpush.msra.mxu1 %v3188_v13  ;;  %1110 = vmatpush.msra.mxu2 %v3189_v14 }
 0x236   : > { %v756_v20 = vpop.f32.mrf.mxu0  ;;  %v776_v21 = vpop.f32.mrf.mxu1 }
 0x237   : > { %v799_v24 = vadd.f32 %v756_v20, %v3192_v23  ;;  %v819_v26 = vadd.f32 %v776_v21, %v377_v17  ;;  %v2723_v17 = vld [vmem:[%s3114_s2 + $0x160] sm:$0xff]  ;;  %v2729_v20 = vld [vmem:[%s3114_s2 + $0x150] sm:$0xff]  ;;  %v2742_v21 = vld [vmem:[%s3114_s2 + $0x138] sm:$0xff] }
 0x238   : > { %v2755_v23 = vld [vmem:[%s3114_s2 + $0x120] sm:$0xff] }
 0x239   : > { %v1546_v27 = vmul.f32 -1.442695, %v799_v24  ;;  %v1547_v29 = vmul.f32 -1.442695, %v819_v26  ;;  %v2768_v24 = vld [vmem:[%s3114_s2 + $0x108] sm:$0xff]  ;;  %v2781_v26 = vld [vmem:[%s3114_s2 + $0xf0] sm:$0xff] }
 0x23b   : > { %1668 = vpow2.f32 %v1546_v27  ;;  %v2794_v27 = vld [vmem:[%s3114_s2 + $0xd8] sm:$0xff] }
 0x23c   : > { %1670 = vpow2.f32 %v1547_v29  ;;  %v2807_v29 = vld [vmem:[%s3114_s2 + $0xc0] sm:$0xff] }
 0x23d   : > { %v796_v25 = vpop.f32.mrf.mxu2 }
 0x23e   : > { %v839_v32 = vadd.f32 %v2549_v22, %v796_v25 }
 0x241   : > { %v1669_v30 = vpop.eup %1668 }
 0x242   : > { %v1671_v33 = vpop.eup %1670  ;;  %v803_v34 = vadd.f32 1.0, %v1669_v30  ;;  %v2820_v30 = vld [vmem:[%s3114_s2 + $0xa8] sm:$0xff] }
 0x243   : > { %v823_v37 = vadd.f32 1.0, %v1671_v33  ;;  %v2833_v33 = vld [vmem:[%s3114_s2 + $0x90] sm:$0xff] }
 0x244   : > { %1672 = vrcp.f32 %v803_v34  ;;  %v815_v54 = vand.u32 2147483648, %v803_v34  ;;  %v813_v9 = vand.u32 2147483647, %v803_v34  ;;  %vm809_vm2 = vweird.f32 %v803_v34 }
 0x245   : > { %1674 = vrcp.f32 %v823_v37  ;;  %v835_v44 = vand.u32 2147483648, %v823_v37  ;;  %vm829_vm6 = vweird.f32 %v823_v37  ;;  %v833_v48 = vand.u32 2147483647, %v823_v37 }
 0x246   : > { %v816_v19 = vor.u32 1.1754944e-38, %v815_v54  ;;  %vm814_vm4 = vcmp.eq.f32.partialorder %v813_v9, 8.507059e+37 }
 0x247   : > { %v836_v55 = vor.u32 1.1754944e-38, %v835_v44  ;;  %vm834_vm8 = vcmp.eq.f32.partialorder %v833_v48, 8.507059e+37 }
 0x24a   : > { %v1673_v40 = vpop.eup %1672 }
 0x24b   : > { %v1675_v43 = vpop.eup %1674  ;;  %v805_v47 = vmul.f32 %v1673_v40, %v803_v34  ;;  %vm810_vm1 = vweird.f32 %v1673_v40  ;;  %v2846_v34 = vld [vmem:[%s3114_s2 + $0x78] sm:$0xff] }
 0x24c   : > { %v825_v50 = vmul.f32 %v1675_v43, %v823_v37  ;;  %vm811_vm3 = vmor %vm809_vm2, %vm810_vm1  ;;  %vm830_vm5 = vweird.f32 %v1675_v43  ;;  %v2859_v37 = vld [vmem:[%s3114_s2 + $0x60] sm:$0xff] }
 0x24d   : > { %v806_v41 = vsub.f32 1.0, %v805_v47  ;;  %vm831_vm7 = vmor %vm829_vm6, %vm830_vm5  ;;  %v2898_v47 = vld [vmem:[%s3114_s2 + $0x18] sm:$0xff] }
 0x24e   : > { %v826_v36 = vsub.f32 1.0, %v825_v50  ;;  %v2911_v50 = vld [vmem:[%s3114_s2] sm:$0xff] }
 0x24f   : > { %v807_v18 = vmul.f32 %v1673_v40, %v806_v41  ;;  %v3194_v41 = vld [vmem:[#allocation29_spill] sm:$0xff] }
 0x250   : > { %v827_v8 = vmul.f32 %v1675_v43, %v826_v36  ;;  %v380_v36 = vadd.f32 %v3194_v41, %v3190_v15 }
 0x251   : > { %v808_v6 = vadd.f32 %v1673_v40, %v807_v18 }
 0x252   : > { %v828_v45 = vadd.f32 %v1675_v43, %v827_v8  ;;  %v3195_v8 = vld [vmem:[#allocation20_spill] sm:$0xff] }
 0x253   : > { %v812_v35 = vsel %vm811_vm3, %v1673_v40, %v808_v6  ;;  %v2872_v40 = vld [vmem:[%s3114_s2 + $0x48] sm:$0xff] }
 0x254   : > { %v817_v60 = vsel %vm814_vm4, %v816_v19, %v812_v35  ;;  %v832_v31 = vsel %vm831_vm7, %v1675_v43, %v828_v45  ;;  %v2885_v43 = vld [vmem:[%s3114_s2 + $0x30] sm:$0xff] }
 0x255   : > { %v840_v52 = vmul.f32 %v839_v32, %v817_v60  ;;  %v837_v1 = vsel %vm834_vm8, %v836_v55, %v832_v31 }
 0x256   : > { %v843_v3 = vsub.f32 1.0, %v837_v1  ;;  %v845_v12 = vmul.f32 %v837_v1, %v2638_v38  ;;  %v2716_v38 = vld [vmem:[%s3114_s2 + $0x168] sm:$0xff] }
 0x257   : > { %v841_v42 = vadd.f32 %v840_v52, %v418_v28 }
 0x259   : > { %1676 = vtanh.f32 %v841_v42 }
 0x25f   : > { %v1677_v7 = vpop.eup %1676 }
 0x260   : > { %v844_v10 = vmul.f32 %v1677_v7, %v843_v3 }
 0x262   : > { %v2700_v13 = vadd.f32 %v845_v12, %v844_v10 }
 0x264   : > { %847 = vst [vmem:[%s1992_s10 + $0x10] sm:$0xff] %v2700_v13  ;;  %867 = vmatmul.f32.vlgmr.msrb.gmra.mxu3 %v2700_v13  ;;  %887 = vmatmul.f32.vlgmr.msrb.gmra.mxu0 %v2700_v13 }
 0x265   : > { %907 = vmatmul.f32.vlgmr.msrb.gmra.mxu1 %v2700_v13  ;;  %1115 = vmatpush.msrb.mxu3 %v2710_v16 }
 0x266   : > { %1187 = vmatpush.msrb.mxu0 %v2716_v38  ;;  %1207 = vmatpush.msrb.mxu1 %v2226_v46  ;;  %v2736_v46 = vld [vmem:[%s3114_s2 + $0x148] sm:$0xff] }
 0x267   : > { %1116 = vmatpush.msrb.mxu3 %v2723_v17 }
 0x268   : > { %1188 = vmatpush.msrb.mxu0 %v2729_v20  ;;  %1208 = vmatpush.msrb.mxu1 %v2245_v49  ;;  %v2749_v49 = vld [vmem:[%s3114_s2 + $0x130] sm:$0xff] }
 0x269   : > { %1117 = vmatpush.msrb.mxu3 %v2736_v46 }
 0x26a   : > { %1189 = vmatpush.msrb.mxu0 %v2742_v21  ;;  %1209 = vmatpush.msrb.mxu1 %v2257_v51  ;;  %v2762_v51 = vld [vmem:[%s3114_s2 + $0x118] sm:$0xff] }
 0x26b   : > { %1118 = vmatpush.msrb.mxu3 %v2749_v49 }
 0x26c   : > { %1190 = vmatpush.msrb.mxu0 %v2755_v23  ;;  %1210 = vmatpush.msrb.mxu1 %v2270_v53  ;;  %v2775_v53 = vld [vmem:[%s3114_s2 + $0x100] sm:$0xff] }
 0x26d   : > { %1119 = vmatpush.msrb.mxu3 %v2762_v51 }
 0x26e   : > { %1191 = vmatpush.msrb.mxu0 %v2768_v24  ;;  %1211 = vmatpush.msrb.mxu1 %v2288_v56  ;;  %v2788_v56 = vld [vmem:[%s3114_s2 + $0xe8] sm:$0xff] }
 0x26f   : > { %1120 = vmatpush.msrb.mxu3 %v2775_v53 }
 0x270   : > { %1192 = vmatpush.msrb.mxu0 %v2781_v26  ;;  %1212 = vmatpush.msrb.mxu1 %v2300_v57  ;;  %v2801_v57 = vld [vmem:[%s3114_s2 + $0xd0] sm:$0xff] }
 0x271   : > { %1121 = vmatpush.msrb.mxu3 %v2788_v56 }
 0x272   : > { %1193 = vmatpush.msrb.mxu0 %v2794_v27  ;;  %1213 = vmatpush.msrb.mxu1 %v2308_v58  ;;  %v2814_v58 = vld [vmem:[%s3114_s2 + $0xb8] sm:$0xff] }
 0x273   : > { %1122 = vmatpush.msrb.mxu3 %v2801_v57 }
 0x274   : > { %1194 = vmatpush.msrb.mxu0 %v2807_v29  ;;  %1214 = vmatpush.msrb.mxu1 %v2317_v59  ;;  %v2827_v59 = vld [vmem:[%s3114_s2 + $0xa0] sm:$0xff] }
 0x275   : > { %1123 = vmatpush.msrb.mxu3 %v2814_v58 }
 0x276   : > { %1195 = vmatpush.msrb.mxu0 %v2820_v30  ;;  %1215 = vmatpush.msrb.mxu1 %v2330_v61  ;;  %v2840_v61 = vld [vmem:[%s3114_s2 + $0x88] sm:$0xff] }
 0x277   : > { %1124 = vmatpush.msrb.mxu3 %v2827_v59 }
 0x278   : > { %1196 = vmatpush.msrb.mxu0 %v2833_v33  ;;  %1216 = vmatpush.msrb.mxu1 %v2342_v62  ;;  %v2853_v62 = vld [vmem:[%s3114_s2 + $0x70] sm:$0xff] }
 0x279   : > { %1125 = vmatpush.msrb.mxu3 %v2840_v61 }
 0x27a   : > { %1197 = vmatpush.msrb.mxu0 %v2846_v34  ;;  %1217 = vmatpush.msrb.mxu1 %v2350_v63  ;;  %v2866_v63 = vld [vmem:[%s3114_s2 + $0x58] sm:$0xff] }
 0x27b   : > { %1126 = vmatpush.msrb.mxu3 %v2853_v62 }
 0x27c   : > { %1198 = vmatpush.msrb.mxu0 %v2859_v37  ;;  %1218 = vmatpush.msrb.mxu1 %v2359_v0  ;;  %v2879_v0 = vld [vmem:[%s3114_s2 + $0x40] sm:$0xff] }
 0x27d   : > { %1127 = vmatpush.msrb.mxu3 %v2866_v63 }
 0x27e   : > { %1199 = vmatpush.msrb.mxu0 %v2872_v40  ;;  %1219 = vmatpush.msrb.mxu1 %v2372_v4  ;;  %v2892_v4 = vld [vmem:[%s3114_s2 + $0x28] sm:$0xff] }
 0x27f   : > { %1128 = vmatpush.msrb.mxu3 %v2879_v0 }
 0x280   : > { %1200 = vmatpush.msrb.mxu0 %v2885_v43  ;;  %1220 = vmatpush.msrb.mxu1 %v3183_v5  ;;  %v2905_v5 = vld [vmem:[%s3114_s2 + $0x10] sm:$0xff] }
 0x281   : > { %1129 = vmatpush.msrb.mxu3 %v2892_v4 }
 0x282   : > { %1201 = vmatpush.msrb.mxu0 %v2898_v47  ;;  %1221 = vmatpush.msrb.mxu1 %v3186_v11 }
 0x283   : > { %1130 = vmatpush.msrb.mxu3 %v2905_v5 }
 0x284   : > { %1202 = vmatpush.msrb.mxu0 %v2911_v50  ;;  %1222 = vmatpush.msrb.mxu1 %v3189_v14 }
 0x2e1   : > { %v888_v11 = vpop.f32.mrf.mxu0 }
 0x2e2   : > { %v931_v54 = vadd.f32 %v888_v11, %v380_v36  ;;  %v908_v1 = vpop.f32.mrf.mxu1  ;;  %v3196_v11 = vld [vmem:[#allocation28_spill] sm:$0xff] }
 0x2e3   : > { %v951_v10 = vadd.f32 %v2549_v22, %v908_v1 }
 0x2e4   : > { %v1549_v18 = vmul.f32 -1.442695, %v931_v54  ;;  %v421_v54 = vadd.f32 %v3196_v11, %v2552_v2 }
 0x2e6   : > { %1678 = vpow2.f32 %v1549_v18 }
 0x2e7   : > { %v868_v9 = vpop.f32.mrf.mxu3 }
 0x2e8   : > { %v911_v25 = vadd.f32 %v868_v9, %v3195_v8 }
 0x2ea   : > { %v1548_v6 = vmul.f32 -1.442695, %v911_v25 }
 0x2ec   : > { %v1679_v19 = vpop.eup %1678  ;;  %1680 = vpow2.f32 %v1548_v6 }
 0x2ed   : > { %v935_v35 = vadd.f32 1.0, %v1679_v19 }
 0x2ef   : > { %1682 = vrcp.f32 %v935_v35  ;;  %v947_v18 = vand.u32 2147483648, %v935_v35  ;;  %vm941_vm14 = vweird.f32 %v935_v35  ;;  %v945_v8 = vand.u32 2147483647, %v935_v35 }
 0x2f1   : > { %v948_v19 = vor.u32 1.1754944e-38, %v947_v18  ;;  %vm946_vm0 = vcmp.eq.f32.partialorder %v945_v8, 8.507059e+37 }
 0x2f2   : > { %v1681_v32 = vpop.eup %1680 }
 0x2f3   : > { %v915_v45 = vadd.f32 1.0, %v1681_v32 }
 0x2f5   : > { %1684 = vrcp.f32 %v915_v45  ;;  %v1683_v60 = vpop.eup %1682  ;;  %v927_v48 = vand.u32 2147483648, %v915_v45  ;;  %v925_v31 = vand.u32 2147483647, %v915_v45  ;;  %vm921_vm10 = vweird.f32 %v915_v45 }
 0x2f6   : > { %v937_v14 = vmul.f32 %v1683_v60, %v935_v35  ;;  %vm942_vm13 = vweird.f32 %v1683_v60  ;;  %v1760_v35 = vld [vmem:[%s3114_s2 + $0x170] sm:$0xff] }
 0x2f7   : > { %v928_v7 = vor.u32 1.1754944e-38, %v927_v48  ;;  %vm926_vm12 = vcmp.eq.f32.partialorder %v925_v31, 8.507059e+37  ;;  %vm943_vm15 = vmor %vm941_vm14, %vm942_vm13 }
 0x2f8   : > { %v938_v44 = vsub.f32 1.0, %v937_v14 }
 0x2fa   : > { %v939_v55 = vmul.f32 %v1683_v60, %v938_v44 }
 0x2fb   : > { %v1685_v39 = vpop.eup %1684 }
 0x2fc   : > { %v917_v28 = vmul.f32 %v1685_v39, %v915_v45  ;;  %vm922_vm9 = vweird.f32 %v1685_v39  ;;  %v940_v41 = vadd.f32 %v1683_v60, %v939_v55 }
 0x2fd   : > { %vm923_vm11 = vmor %vm921_vm10, %vm922_vm9 }
 0x2fe   : > { %v918_v52 = vsub.f32 1.0, %v917_v28  ;;  %v944_v6 = vsel %vm943_vm15, %v1683_v60, %v940_v41  ;;  %v3197_v60 = vld [vmem:[#allocation31_spill] sm:$0xff] }
 0x2ff   : > { %v949_v32 = vsel %vm946_vm0, %v948_v19, %v944_v6 }
 0x300   : > { %v919_v42 = vmul.f32 %v1685_v39, %v918_v52  ;;  %v955_v45 = vsub.f32 1.0, %v949_v32  ;;  %v957_v28 = vmul.f32 %v949_v32, %v2700_v13  ;;  %v1761_v13 = vld [vmem:[%s3114_s2 + $0x158] sm:$0xff]  ;;  %v383_v52 = vadd.f32 %v3197_v60, %v3190_v15 }
 0x302   : > { %v920_v3 = vadd.f32 %v1685_v39, %v919_v42 }
 0x304   : > { %v924_v12 = vsel %vm923_vm11, %v1685_v39, %v920_v3 }
 0x305   : > { %v929_v36 = vsel %vm926_vm12, %v928_v7, %v924_v12 }
 0x306   : > { %v952_v9 = vmul.f32 %v951_v10, %v929_v36 }
 0x308   : > { %v953_v25 = vadd.f32 %v952_v9, %v421_v54 }
 0x30a   : > { %1686 = vtanh.f32 %v953_v25 }
 0x310   : > { %v1687_v14 = vpop.eup %1686 }
 0x311   : > { %v956_v39 = vmul.f32 %v1687_v14, %v955_v45 }
 0x313   : > { %v2922_v44 = vadd.f32 %v957_v28, %v956_v39 }
 0x315   : > { %959 = vst [vmem:[%s1992_s10 + $0x18] sm:$0xff] %v2922_v44  ;;  %979 = vmatmul.f32.vlgmr.msrb.gmra.mxu2 %v2922_v44  ;;  %999 = vmatmul.f32.vlgmr.msra.gmra.mxu3 %v2922_v44 }
 0x316   : > { %1019 = vmatmul.f32.vlgmr.msra.gmra.mxu0 %v2922_v44  ;;  %1227 = vmatpush.msrb.mxu2 %v2710_v16 }
 0x317   : > { %1299 = vmatpush.msra.mxu3 %v2716_v38  ;;  %1319 = vmatpush.msra.mxu0 %v1760_v35  ;;  %v1762_v38 = vld [vmem:[%s3114_s2 + $0x140] sm:$0xff] }
 0x318   : > { %1228 = vmatpush.msrb.mxu2 %v2723_v17 }
 0x319   : > { %1300 = vmatpush.msra.mxu3 %v2729_v20  ;;  %1320 = vmatpush.msra.mxu0 %v1761_v13  ;;  %v1763_v20 = vld [vmem:[%s3114_s2 + $0x128] sm:$0xff] }
 0x31a   : > { %1229 = vmatpush.msrb.mxu2 %v2736_v46 }
 0x31b   : > { %1301 = vmatpush.msra.mxu3 %v2742_v21  ;;  %1321 = vmatpush.msra.mxu0 %v1762_v38  ;;  %v1764_v21 = vld [vmem:[%s3114_s2 + $0x110] sm:$0xff]  ;;  %v3199_v38 = vld [vmem:[#allocation30_spill] sm:$0xff] }
 0x31c   : > { %1230 = vmatpush.msrb.mxu2 %v2749_v49 }
 0x31d   : > { %1302 = vmatpush.msra.mxu3 %v2755_v23  ;;  %1322 = vmatpush.msra.mxu0 %v1763_v20  ;;  %v1765_v23 = vld [vmem:[%s3114_s2 + $0xf8] sm:$0xff]  ;;  %v424_v20 = vadd.f32 %v3199_v38, %v2552_v2 }
 0x31e   : > { %1231 = vmatpush.msrb.mxu2 %v2762_v51 }
 0x31f   : > { %1303 = vmatpush.msra.mxu3 %v2768_v24  ;;  %1323 = vmatpush.msra.mxu0 %v1764_v21  ;;  %v1766_v24 = vld [vmem:[%s3114_s2 + $0xe0] sm:$0xff] }
 0x320   : > { %1232 = vmatpush.msrb.mxu2 %v2775_v53 }
 0x321   : > { %1304 = vmatpush.msra.mxu3 %v2781_v26  ;;  %1324 = vmatpush.msra.mxu0 %v1765_v23  ;;  %v1767_v26 = vld [vmem:[%s3114_s2 + $0xc8] sm:$0xff] }
 0x322   : > { %1233 = vmatpush.msrb.mxu2 %v2788_v56 }
 0x323   : > { %1305 = vmatpush.msra.mxu3 %v2794_v27  ;;  %1325 = vmatpush.msra.mxu0 %v1766_v24  ;;  %v1768_v27 = vld [vmem:[%s3114_s2 + $0xb0] sm:$0xff] }
 0x324   : > { %1234 = vmatpush.msrb.mxu2 %v2801_v57 }
 0x325   : > { %1306 = vmatpush.msra.mxu3 %v2807_v29  ;;  %1326 = vmatpush.msra.mxu0 %v1767_v26  ;;  %v1769_v29 = vld [vmem:[%s3114_s2 + $0x98] sm:$0xff] }
 0x326   : > { %1235 = vmatpush.msrb.mxu2 %v2814_v58 }
 0x327   : > { %1307 = vmatpush.msra.mxu3 %v2820_v30  ;;  %1327 = vmatpush.msra.mxu0 %v1768_v27  ;;  %v1770_v30 = vld [vmem:[%s3114_s2 + $0x80] sm:$0xff] }
 0x328   : > { %1236 = vmatpush.msrb.mxu2 %v2827_v59 }
 0x329   : > { %1308 = vmatpush.msra.mxu3 %v2833_v33  ;;  %1328 = vmatpush.msra.mxu0 %v1769_v29  ;;  %v1771_v33 = vld [vmem:[%s3114_s2 + $0x68] sm:$0xff] }
 0x32a   : > { %1237 = vmatpush.msrb.mxu2 %v2840_v61 }
 0x32b   : > { %1309 = vmatpush.msra.mxu3 %v2846_v34  ;;  %1329 = vmatpush.msra.mxu0 %v1770_v30  ;;  %v1772_v34 = vld [vmem:[%s3114_s2 + $0x50] sm:$0xff] }
 0x32c   : > { %1238 = vmatpush.msrb.mxu2 %v2853_v62 }
 0x32d   : > { %1310 = vmatpush.msra.mxu3 %v2859_v37  ;;  %1330 = vmatpush.msra.mxu0 %v1771_v33  ;;  %v1773_v37 = vld [vmem:[%s3114_s2 + $0x38] sm:$0xff] }
 0x32e   : > { %1239 = vmatpush.msrb.mxu2 %v2866_v63 }
 0x32f   : > { %1311 = vmatpush.msra.mxu3 %v2872_v40  ;;  %1331 = vmatpush.msra.mxu0 %v1772_v34  ;;  %v1774_v40 = vld [vmem:[%s3114_s2 + $0x20] sm:$0xff] }
 0x330   : > { %1240 = vmatpush.msrb.mxu2 %v2879_v0 }
 0x331   : > { %1312 = vmatpush.msra.mxu3 %v2885_v43  ;;  %1332 = vmatpush.msra.mxu0 %v1773_v37  ;;  %v1775_v43 = vld [vmem:[%s3114_s2 + $0x8] sm:$0xff] }
 0x332   : > { %1241 = vmatpush.msrb.mxu2 %v2892_v4 }
 0x333   : > { %1313 = vmatpush.msra.mxu3 %v2898_v47  ;;  %1333 = vmatpush.msra.mxu0 %v1774_v40  ;;  %v3198_v47 = vld [vmem:[#allocation21_spill] sm:$0xff] }
 0x334   : > { %1242 = vmatpush.msrb.mxu2 %v2905_v5 }
 0x335   : > { %1314 = vmatpush.msra.mxu3 %v2911_v50  ;;  %1334 = vmatpush.msra.mxu0 %v1775_v43 }
 0x393   : > { %v1020_v19 = vpop.f32.mrf.mxu0 }
 0x394   : > { %v1063_v39 = vadd.f32 %v2549_v22, %v1020_v19 }
 0x398   : > { %v980_v48 = vpop.f32.mrf.mxu2  ;;  %v1000_v42 = vpop.f32.mrf.mxu3 }
 0x399   : > { %v1023_v31 = vadd.f32 %v980_v48, %v3198_v47  ;;  %v1043_v55 = vadd.f32 %v1000_v42, %v383_v52 }
 0x39b   : > { %v1550_v1 = vmul.f32 -1.442695, %v1023_v31  ;;  %v1551_v3 = vmul.f32 -1.442695, %v1043_v55 }
 0x39d   : > { %1688 = vpow2.f32 %v1550_v1 }
 0x39e   : > { %1690 = vpow2.f32 %v1551_v3  ;;  %v3045_v3 = vld [vmem:[%s3116_s4] ss:$0 sm:$0xff] }
 0x3a3   : > { %v1689_v7 = vpop.eup %1688 }
 0x3a4   : > { %v1691_v10 = vpop.eup %1690  ;;  %v1027_v50 = vadd.f32 1.0, %v1689_v7 }
 0x3a5   : > { %v1047_v12 = vadd.f32 1.0, %v1691_v10  ;;  %v3202_v10 = vld [vmem:[#allocation32_spill] sm:$0xff] }
 0x3a6   : > { %1692 = vrcp.f32 %v1027_v50  ;;  %v1039_v9 = vand.u32 2147483648, %v1027_v50  ;;  %v1037_v6 = vand.u32 2147483647, %v1027_v50  ;;  %vm1033_vm2 = vweird.f32 %v1027_v50 }
 0x3a7   : > { %1694 = vrcp.f32 %v1047_v12  ;;  %v1059_v23 = vand.u32 2147483648, %v1047_v12  ;;  %vm1053_vm6 = vweird.f32 %v1047_v12  ;;  %v1057_v24 = vand.u32 2147483647, %v1047_v12 }
 0x3a8   : > { %v1040_v14 = vor.u32 1.1754944e-38, %v1039_v9  ;;  %vm1038_vm4 = vcmp.eq.f32.partialorder %v1037_v6, 8.507059e+37 }
 0x3a9   : > { %v1060_v29 = vor.u32 1.1754944e-38, %v1059_v23  ;;  %vm1058_vm8 = vcmp.eq.f32.partialorder %v1057_v24, 8.507059e+37 }
 0x3ac   : > { %v1693_v41 = vpop.eup %1692 }
 0x3ad   : > { %v1695_v36 = vpop.eup %1694  ;;  %v1029_v11 = vmul.f32 %v1693_v41, %v1027_v50  ;;  %vm1034_vm1 = vweird.f32 %v1693_v41  ;;  %v427_v50 = vadd.f32 %v3202_v10, %v2552_v2  ;;  %v3206_v10 = vld [vmem:[#allocation25_spill] sm:$0xff] }
 0x3ae   : > { %v1049_v54 = vmul.f32 %v1695_v36, %v1047_v12  ;;  %vm1035_vm3 = vmor %vm1033_vm2, %vm1034_vm1  ;;  %vm1054_vm5 = vweird.f32 %v1695_v36 }
 0x3af   : > { %v1030_v18 = vsub.f32 1.0, %v1029_v11  ;;  %vm1055_vm7 = vmor %vm1053_vm6, %vm1054_vm5 }
 0x3b0   : > { %v1050_v8 = vsub.f32 1.0, %v1049_v54 }
 0x3b1   : > { %v1031_v25 = vmul.f32 %v1693_v41, %v1030_v18 }
 0x3b2   : > { %v1051_v32 = vmul.f32 %v1695_v36, %v1050_v8 }
 0x3b3   : > { %v1032_v45 = vadd.f32 %v1693_v41, %v1031_v25 }
 0x3b4   : > { %v1052_v13 = vadd.f32 %v1695_v36, %v1051_v32 }
 0x3b5   : > { %v1036_v28 = vsel %vm1035_vm3, %v1693_v41, %v1032_v45 }
 0x3b6   : > { %v1041_v35 = vsel %vm1038_vm4, %v1040_v14, %v1036_v28  ;;  %v1056_v27 = vsel %vm1055_vm7, %v1695_v36, %v1052_v13  ;;  %v3203_v28 = vld [vmem:[#allocation35_spill] sm:$0xff] }
 0x3b7   : > { %v1064_v21 = vmul.f32 %v1063_v39, %v1041_v35  ;;  %v1061_v22 = vsel %vm1058_vm8, %v1060_v29, %v1056_v27  ;;  %v389_v35 = vadd.f32 %v3203_v28, %v3190_v15 }
 0x3b8   : > { %v1067_v30 = vsub.f32 1.0, %v1061_v22  ;;  %v1069_v37 = vmul.f32 %v1061_v22, %v2922_v44 }
 0x3b9   : > { %v1065_v26 = vadd.f32 %v1064_v21, %v424_v20  ;;  %v3204_v20 = vld [vmem:[#allocation23_spill] sm:$0xff] }
 0x3bb   : > { %1696 = vtanh.f32 %v1065_v26 }
 0x3c1   : > { %v1697_v33 = vpop.eup %1696 }
 0x3c2   : > { %v1068_v34 = vmul.f32 %v1697_v33, %v1067_v30 }
 0x3c4   : > { %v3016_v40 = vadd.f32 %v1069_v37, %v1068_v34 }
 0x3c6   : > { %1071 = vst [vmem:[%s1992_s10 + $0x20] sm:$0xff] %v3016_v40  ;;  %1091 = vmatmul.f32.vlgmr.msra.gmra.mxu1 %v3016_v40  ;;  %1111 = vmatmul.f32.vlgmr.msra.gmra.mxu2 %v3016_v40 }
 0x3c7   : > { %1131 = vmatmul.f32.vlgmr.msrb.gmra.mxu3 %v3016_v40  ;;  %1339 = vmatpush.msra.mxu1 %v2710_v16 }
 0x3c9   : > { %1340 = vmatpush.msra.mxu1 %v2723_v17  ;;  %v3200_v17 = vld [vmem:[#allocation22_spill] sm:$0xff] }
 0x3cb   : > { %1341 = vmatpush.msra.mxu1 %v2736_v46 }
 0x3cd   : > { %1342 = vmatpush.msra.mxu1 %v2749_v49 }
 0x3cf   : > { %1343 = vmatpush.msra.mxu1 %v2762_v51  ;;  %v3201_v51 = vld [vmem:[#allocation33_spill] sm:$0xff] }
 0x3d1   : > { %1344 = vmatpush.msra.mxu1 %v2775_v53  ;;  %v386_v53 = vadd.f32 %v3201_v51, %v3190_v15 }
 0x3d3   : > { %1345 = vmatpush.msra.mxu1 %v2788_v56 }
 0x3d5   : > { %1346 = vmatpush.msra.mxu1 %v2801_v57 }
 0x3d7   : > { %1347 = vmatpush.msra.mxu1 %v2814_v58 }
 0x3d9   : > { %1348 = vmatpush.msra.mxu1 %v2827_v59 }
 0x3db   : > { %1349 = vmatpush.msra.mxu1 %v2840_v61 }
 0x3dd   : > { %1350 = vmatpush.msra.mxu1 %v2853_v62 }
 0x3df   : > { %1351 = vmatpush.msra.mxu1 %v2866_v63 }
 0x3e1   : > { %1352 = vmatpush.msra.mxu1 %v2879_v0 }
 0x3e3   : > { %1353 = vmatpush.msra.mxu1 %v2892_v4 }
 0x3e5   : > { %1354 = vmatpush.msra.mxu1 %v2905_v5 }
 0x443   : > { %v1092_v16 = vpop.f32.mrf.mxu1 }
 0x444   : > { %v1135_v46 = vadd.f32 %v1092_v16, %v3200_v17 }
 0x446   : > { %v1552_v49 = vmul.f32 -1.442695, %v1135_v46 }
 0x448   : > { %1698 = vpow2.f32 %v1552_v49 }
 0x449   : > { %v1112_v56 = vpop.f32.mrf.mxu2 }
 0x44a   : > { %v1155_v57 = vadd.f32 %v1112_v56, %v386_v53  ;;  %v1132_v48 = vpop.f32.mrf.mxu3 }
 0x44b   : > { %v1175_v7 = vadd.f32 %v3045_v3, %v1132_v48 }
 0x44c   : > { %v1553_v58 = vmul.f32 -1.442695, %v1155_v57 }
 0x44e   : > { %v1699_v59 = vpop.eup %1698  ;;  %1700 = vpow2.f32 %v1553_v58 }
 0x44f   : > { %v1139_v61 = vadd.f32 1.0, %v1699_v59 }
 0x451   : > { %1702 = vrcp.f32 %v1139_v61  ;;  %v1151_v44 = vand.u32 2147483648, %v1139_v61  ;;  %v1149_v60 = vand.u32 2147483647, %v1139_v61  ;;  %vm1145_vm10 = vweird.f32 %v1139_v61 }
 0x453   : > { %v1152_v31 = vor.u32 1.1754944e-38, %v1151_v44  ;;  %vm1150_vm12 = vcmp.eq.f32.partialorder %v1149_v60, 8.507059e+37 }
 0x454   : > { %v1701_v62 = vpop.eup %1700 }
 0x455   : > { %v1159_v63 = vadd.f32 1.0, %v1701_v62 }
 0x457   : > { %v1703_v0 = vpop.eup %1702  ;;  %1704 = vrcp.f32 %v1159_v63  ;;  %v1171_v36 = vand.u32 2147483648, %v1159_v63  ;;  %v1169_v54 = vand.u32 2147483647, %v1159_v63  ;;  %vm1165_vm14 = vweird.f32 %v1159_v63 }
 0x458   : > { %v1141_v4 = vmul.f32 %v1703_v0, %v1139_v61  ;;  %vm1146_vm9 = vweird.f32 %v1703_v0 }
 0x459   : > { %vm1147_vm11 = vmor %vm1145_vm10, %vm1146_vm9  ;;  %v1172_v8 = vor.u32 1.1754944e-38, %v1171_v36  ;;  %vm1170_vm0 = vcmp.eq.f32.partialorder %v1169_v54, 8.507059e+37  ;;  %v3207_v54 = vld [vmem:[#allocation18_spill] sm:$0xff] }
 0x45a   : > { %v1142_v5 = vsub.f32 1.0, %v1141_v4 }
 0x45c   : > { %v1143_v43 = vmul.f32 %v1703_v0, %v1142_v5 }
 0x45d   : > { %v1705_v52 = vpop.eup %1704 }
 0x45e   : > { %v1161_v42 = vmul.f32 %v1705_v52, %v1159_v63  ;;  %v1144_v47 = vadd.f32 %v1703_v0, %v1143_v43  ;;  %vm1166_vm13 = vweird.f32 %v1705_v52 }
 0x45f   : > { %vm1167_vm15 = vmor %vm1165_vm14, %vm1166_vm13 }
 0x460   : > { %v1162_v55 = vsub.f32 1.0, %v1161_v42  ;;  %v1148_v1 = vsel %vm1147_vm11, %v1703_v0, %v1144_v47  ;;  %v3205_v0 = vld [vmem:[#allocation34_spill] sm:$0xff] }
 0x461   : > { %v1153_v12 = vsel %vm1150_vm12, %v1152_v31, %v1148_v1  ;;  %v430_v4 = vadd.f32 %v3205_v0, %v2552_v2 }
 0x462   : > { %v1163_v41 = vmul.f32 %v1705_v52, %v1162_v55  ;;  %v1176_v11 = vmul.f32 %v1175_v7, %v1153_v12 }
 0x464   : > { %v1164_v18 = vadd.f32 %v1705_v52, %v1163_v41  ;;  %v1177_v9 = vadd.f32 %v1176_v11, %v427_v50  ;;  %v392_v50 = vadd.f32 %v3206_v10, %v3190_v15 }
 0x466   : > { %v1168_v25 = vsel %vm1167_vm15, %v1705_v52, %v1164_v18  ;;  %1706 = vtanh.f32 %v1177_v9 }
 0x467   : > { %v1173_v6 = vsel %vm1170_vm0, %v1172_v8, %v1168_v25 }
 0x468   : > { %v1179_v19 = vsub.f32 1.0, %v1173_v6  ;;  %v1181_v14 = vmul.f32 %v1173_v6, %v3016_v40 }
 0x46c   : > { %v1707_v32 = vpop.eup %1706 }
 0x46d   : > { %v1180_v45 = vmul.f32 %v1707_v32, %v1179_v19 }
 0x46f   : > { %v1182_v39 = vadd.f32 %v1181_v14, %v1180_v45 }
 0x471   : > { %1183 = vst [vmem:[%s1992_s10 + $0x28] sm:$0xff] %v1182_v39  ;;  %1203 = vmatmul.f32.vlgmr.msrb.gmra.mxu0 %v1182_v39  ;;  %1223 = vmatmul.f32.vlgmr.msrb.gmra.mxu1 %v1182_v39 }
 0x472   : > { %1243 = vmatmul.f32.vlgmr.msrb.gmra.mxu2 %v1182_v39 }
 0x4ee   : > { %v1204_v13 = vpop.f32.mrf.mxu0  ;;  %v1224_v38 = vpop.f32.mrf.mxu1 }
 0x4ef   : > { %v1247_v21 = vadd.f32 %v1204_v13, %v3204_v20  ;;  %v1267_v23 = vadd.f32 %v1224_v38, %v389_v35 }
 0x4f1   : > { %v1554_v24 = vmul.f32 -1.442695, %v1247_v21  ;;  %v1555_v26 = vmul.f32 -1.442695, %v1267_v23 }
 0x4f3   : > { %1708 = vpow2.f32 %v1554_v24 }
 0x4f4   : > { %1710 = vpow2.f32 %v1555_v26 }
 0x4f5   : > { %v1244_v56 = vpop.f32.mrf.mxu2 }
 0x4f6   : > { %v1287_v61 = vadd.f32 %v3045_v3, %v1244_v56 }
 0x4f9   : > { %v1709_v27 = vpop.eup %1708 }
 0x4fa   : > { %v1711_v29 = vpop.eup %1710  ;;  %v1251_v22 = vadd.f32 1.0, %v1709_v27 }
 0x4fb   : > { %v1271_v30 = vadd.f32 1.0, %v1711_v29 }
 0x4fc   : > { %1712 = vrcp.f32 %v1251_v22  ;;  %v1263_v46 = vand.u32 2147483648, %v1251_v22  ;;  %v1261_v51 = vand.u32 2147483647, %v1251_v22  ;;  %vm1257_vm2 = vweird.f32 %v1251_v22 }
 0x4fd   : > { %1714 = vrcp.f32 %v1271_v30  ;;  %v1283_v5 = vand.u32 2147483648, %v1271_v30  ;;  %vm1277_vm6 = vweird.f32 %v1271_v30  ;;  %v1281_v43 = vand.u32 2147483647, %v1271_v30 }
 0x4fe   : > { %v1264_v58 = vor.u32 1.1754944e-38, %v1263_v46  ;;  %vm1262_vm4 = vcmp.eq.f32.partialorder %v1261_v51, 8.507059e+37 }
 0x4ff   : > { %v1284_v48 = vor.u32 1.1754944e-38, %v1283_v5  ;;  %vm1282_vm8 = vcmp.eq.f32.partialorder %v1281_v43, 8.507059e+37 }
 0x502   : > { %v1713_v33 = vpop.eup %1712 }
 0x503   : > { %v1715_v34 = vpop.eup %1714  ;;  %v1253_v37 = vmul.f32 %v1713_v33, %v1251_v22  ;;  %vm1258_vm1 = vweird.f32 %v1713_v33 }
 0x504   : > { %v1273_v40 = vmul.f32 %v1715_v34, %v1271_v30  ;;  %vm1259_vm3 = vmor %vm1257_vm2, %vm1258_vm1  ;;  %vm1278_vm5 = vweird.f32 %v1715_v34  ;;  %v3208_v30 = vld [vmem:[#allocation36_spill] sm:$0xff] }
 0x505   : > { %v1254_v16 = vsub.f32 1.0, %v1253_v37  ;;  %vm1279_vm7 = vmor %vm1277_vm6, %vm1278_vm5 }
 0x506   : > { %v1274_v17 = vsub.f32 1.0, %v1273_v40 }
 0x507   : > { %v1255_v49 = vmul.f32 %v1713_v33, %v1254_v16 }
 0x508   : > { %v1275_v53 = vmul.f32 %v1715_v34, %v1274_v17 }
 0x509   : > { %v1256_v57 = vadd.f32 %v1713_v33, %v1255_v49 }
 0x50a   : > { %v1276_v62 = vadd.f32 %v1715_v34, %v1275_v53 }
 0x50b   : > { %v1260_v59 = vsel %vm1259_vm3, %v1713_v33, %v1256_v57  ;;  %v433_v33 = vadd.f32 %v3208_v30, %v2552_v2 }
 0x50c   : > { %v1265_v63 = vsel %vm1262_vm4, %v1264_v58, %v1260_v59  ;;  %v1280_v52 = vsel %vm1279_vm7, %v1715_v34, %v1276_v62 }
 0x50d   : > { %v1288_v44 = vmul.f32 %v1287_v61, %v1265_v63  ;;  %v1285_v42 = vsel %vm1282_vm8, %v1284_v48, %v1280_v52 }
 0x50e   : > { %v1291_v47 = vsub.f32 1.0, %v1285_v42  ;;  %v1293_v1 = vmul.f32 %v1285_v42, %v1182_v39 }
 0x50f   : > { %v1289_v60 = vadd.f32 %v1288_v44, %v430_v4 }
 0x511   : > { %1716 = vtanh.f32 %v1289_v60 }
 0x517   : > { %v1717_v31 = vpop.eup %1716 }
 0x518   : > { %v1292_v55 = vmul.f32 %v1717_v31, %v1291_v47 }
 0x51a   : > { %v1294_v7 = vadd.f32 %v1293_v1, %v1292_v55 }
 0x51c   : > { %1295 = vst [vmem:[%s1992_s10 + $0x30] sm:$0xff] %v1294_v7  ;;  %1315 = vmatmul.f32.vlgmr.msra.gmra.mxu3 %v1294_v7  ;;  %1335 = vmatmul.f32.vlgmr.msra.gmra.mxu0 %v1294_v7 }
 0x51d   : > { %1355 = vmatmul.f32.vlgmr.msra.gmra.mxu1 %v1294_v7 }
 0x599   : > { %v1336_v12 = vpop.f32.mrf.mxu0 }
 0x59a   : > { %v1379_v41 = vadd.f32 %v1336_v12, %v392_v50  ;;  %v1356_v21 = vpop.f32.mrf.mxu1 }
 0x59b   : > { %v1399_v26 = vadd.f32 %v3045_v3, %v1356_v21 }
 0x59c   : > { %v1557_v36 = vmul.f32 -1.442695, %v1379_v41 }
 0x59e   : > { %1718 = vpow2.f32 %v1557_v36 }
 0x59f   : > { %v1316_v11 = vpop.f32.mrf.mxu3 }
 0x5a0   : > { %v1359_v18 = vadd.f32 %v1316_v11, %v3207_v54 }
 0x5a2   : > { %v1556_v9 = vmul.f32 -1.442695, %v1359_v18 }
 0x5a4   : > { %v1719_v8 = vpop.eup %1718  ;;  %1720 = vpow2.f32 %v1556_v9 }
 0x5a5   : > { %v1383_v25 = vadd.f32 1.0, %v1719_v8 }
 0x5a7   : > { %1722 = vrcp.f32 %v1383_v25  ;;  %v1395_v34 = vand.u32 2147483648, %v1383_v25  ;;  %vm1389_vm14 = vweird.f32 %v1383_v25  ;;  %v1393_v40 = vand.u32 2147483647, %v1383_v25 }
 0x5a9   : > { %v1396_v3 = vor.u32 1.1754944e-38, %v1395_v34  ;;  %vm1394_vm0 = vcmp.eq.f32.partialorder %v1393_v40, 8.507059e+37 }
 0x5aa   : > { %v1721_v6 = vpop.eup %1720 }
 0x5ab   : > { %v1363_v19 = vadd.f32 1.0, %v1721_v6 }
 0x5ad   : > { %1724 = vrcp.f32 %v1363_v19  ;;  %v1723_v32 = vpop.eup %1722  ;;  %v1375_v35 = vand.u32 2147483648, %v1363_v19  ;;  %v1373_v38 = vand.u32 2147483647, %v1363_v19  ;;  %vm1369_vm10 = vweird.f32 %v1363_v19 }
 0x5ae   : > { %v1385_v45 = vmul.f32 %v1723_v32, %v1383_v25  ;;  %vm1390_vm13 = vweird.f32 %v1723_v32 }
 0x5af   : > { %v1376_v24 = vor.u32 1.1754944e-38, %v1375_v35  ;;  %vm1374_vm12 = vcmp.eq.f32.partialorder %v1373_v38, 8.507059e+37  ;;  %vm1391_vm15 = vmor %vm1389_vm14, %vm1390_vm13 }
 0x5b0   : > { %v1386_v39 = vsub.f32 1.0, %v1385_v45 }
 0x5b2   : > { %v1387_v20 = vmul.f32 %v1723_v32, %v1386_v39 }
 0x5b3   : > { %v1725_v14 = vpop.eup %1724 }
 0x5b4   : > { %v1365_v15 = vmul.f32 %v1725_v14, %v1363_v19  ;;  %vm1370_vm9 = vweird.f32 %v1725_v14  ;;  %v1388_v29 = vadd.f32 %v1723_v32, %v1387_v20 }
 0x5b5   : > { %vm1371_vm11 = vmor %vm1369_vm10, %vm1370_vm9 }
 0x5b6   : > { %v1366_v28 = vsub.f32 1.0, %v1365_v15  ;;  %v1392_v17 = vsel %vm1391_vm15, %v1723_v32, %v1388_v29 }
 0x5b7   : > { %v1397_v46 = vsel %vm1394_vm0, %v1396_v3, %v1392_v17 }
 0x5b8   : > { %v1367_v13 = vmul.f32 %v1725_v14, %v1366_v28  ;;  %v1403_v2 = vsub.f32 1.0, %v1397_v46  ;;  %v1405_v51 = vmul.f32 %v1397_v46, %v1294_v7 }
 0x5ba   : > { %v1368_v23 = vadd.f32 %v1725_v14, %v1367_v13 }
 0x5bc   : > { %v1372_v27 = vsel %vm1371_vm11, %v1725_v14, %v1368_v23 }
 0x5bd   : > { %v1377_v22 = vsel %vm1374_vm12, %v1376_v24, %v1372_v27 }
 0x5be   : > { %v1400_v37 = vmul.f32 %v1399_v26, %v1377_v22 }
 0x5c0   : > { %v1401_v16 = vadd.f32 %v1400_v37, %v433_v33 }
 0x5c2   : > { %1726 = vtanh.f32 %v1401_v16 }
 0x5c8   : > { %v1727_v49 = vpop.eup %1726 }
 0x5c9   : > { %v1404_v53 = vmul.f32 %v1727_v49, %v1403_v2 }
 0x5cb   : > { %v1406_v56 = vadd.f32 %v1405_v51, %v1404_v53 }
 0x5cd   : > { %1407 = vst [vmem:[%s1992_s10 + $0x38] sm:$0xff] %v1406_v56 }
 0x5ce   : > { %1408 = vst [vmem:[#allocation2] sm:$0xff] %v1406_v56 }
 0x5cf   : > { %1804 = shalt.err (!%p1801_p9)
}
 0x5d0   : > { %s1874_s10 = smov 128   ;;  %s1875_s26 = smov 8  }
 0x5d1   : > { %1573 = dma.vmem_to_hbm [thread:$0]  (%p1957_p3), %s1425_s29, 1024, %s1427_s13, %s1410_s27, %s1874_s10, %s1874_s10, %s1875_s26  }
 0x5d2 PF: > { %p1579_p10 = scmp.ge.s32.totalorder %s1871_s25, 2  ;;  %s1441_s21 = sand.u32 1, %s1843_s18  }
 0x5d3   : > { %s1442_s14 = scalar_lea.sflag [#allocation5], %s1441_s21 }
 0x5d4   : > { %p1576_p11 = pnand %p1579_p10, %p1966_p8 }
 0x5d6   : > { %p1577_p12 = pneg %p1576_p11 }
 0x5d8   : > { %1838 = dma.done.wait (%p1577_p12), %s1442_s14, 1024  }
 0x5d9   : > { %1840 = vsyncadd (%p1577_p12), %s1442_s14, 4294966272  ;;  %s18_s25 = sadd.s32 1, %s1871_s25   ;;  %s3210_s6 = sld [smem:[#allocation7_spill]] }
 0x5da   : > { %p15_p13 = scmp.ge.s32.totalorder %s18_s25, 8   ;;  %s3211_s18 = smov %s1847_s19 }
 0x5db   : > { %s3212_s19 = smov %s1851_s20  ;;  %s3213_s20 = smov %s1975_s11 }
 0x5dc   : > { %s3214_s21 = smov %s1863_s23  ;;  %s3215_s22 = smov %s1867_s24 }
 0x5dd   : > { %s3216_s23 = smov %s3219_s28  ;;  %17 = sbr.rel (!%p15_p13) target bundleno = 5 (0x5), region = 79 }
 0x5df   : > { %s3217_s24 = smov %s3210_s6 }
 0x5e2   :  { %1448 = vsyncpa [#allocation5], 1 }
 0x5e3   :  { %1450 = vsyncpa [#allocation5 + $0x1], 1 }

</bundles_post_ra>
